<compile_context>
chip_gen: v5e
topology: v5e:2x2
jax: 0.10.0
libtpu: 0.0.40
codegen_flags: <defaults>
</compile_context>

<pallas_src>
import functools

import jax
import jax.numpy as jnp
from jax.experimental import pallas as pl
from jax.experimental.pallas import tpu as pltpu


def _conv1x1_sigmoid_pad_kernel(*refs, other_const, has_other):
    """One grid step = (batch b, input-row tile r).

    Refs (in order):
      x_ref   : (1, Cin, TR, W)    streamed input row tile
      w_ref   : (Cout, Cin)        resident
      b_ref   : (Cout, 1)          resident
      oth_ref : (1, Cout, Hp, Wp)  [only if has_other] resident per batch
      o_ref   : (1, Cout, Hp, Wp)  resident per batch (revisited across r)
    """
    if has_other:
        x_ref, w_ref, b_ref, oth_ref, o_ref = refs
    else:
        x_ref, w_ref, b_ref, o_ref = refs
        oth_ref = None

    r = pl.program_id(1)
    tr = x_ref.shape[2]   # rows per tile (static)
    w = x_ref.shape[3]    # input width (static)

    # Once per batch element: fill the whole padded block with the border
    # value sigmoid(bias) [+ other].  The interior is overwritten below by
    # this and the following row-tile steps; only the 1-px border keeps the
    # fill, which is exactly what the zero-padded 1x1 conv produces there.
    @pl.when(r == 0)
    def _fill_border():
        border = jax.nn.sigmoid(b_ref[...].astype(jnp.float32))[:, :, None]
        full = jnp.broadcast_to(border, o_ref.shape[1:])
        if has_other:
            full = full + oth_ref[0]
        else:
            full = full + other_const
        o_ref[0] = full.astype(o_ref.dtype)

    # Interior rows of this tile: out[:, 1 + r*TR + i, 1:W+1].
    w_mat = w_ref[...]
    b_col = b_ref[...]
    for i in range(tr):  # static unroll (tr <= 32 for all sane heights)
        xrow = x_ref[0, :, i, :].astype(jnp.float32)                   # (Cin, W)
        acc = jnp.dot(w_mat, xrow, preferred_element_type=jnp.float32)
        acc = acc + b_col                                              # (Cout, W)
        val = jax.nn.sigmoid(acc)[:, None, :]                          # (Cout,1,W)
        out_row = 1 + r * tr + i
        if has_other:
            val = val + oth_ref[0, :, pl.ds(out_row, 1), 1:w + 1]
        else:
            val = val + other_const
        o_ref[0, :, pl.ds(out_row, 1), 1:w + 1] = val.astype(o_ref.dtype)


def _pick_row_tile(h):
    """Rows per grid step: must divide H and be a multiple of 8 (sublane
    tiling); prefer >=2 tiles so the input stream pipelines.  Falls back to
    the full extent (always legal) for heights not divisible by 8."""
    for tr in (32, 16, 8):
        if h % tr == 0 and h // tr >= 2:
            return tr
    for tr in (32, 16, 8):
        if h % tr == 0:
            return tr
    return h


def model_forward(x_nchw, weight, bias, other=None):
    """Forward pass of the PyTorch module.

    x_nchw : (N, Cin, H, W) float32
    weight : (Cout, Cin, 1, 1) or (Cout, Cin)  -- Conv2d(16, 16, 1) weight
    bias   : (Cout,)
    other  : optional array broadcastable to (N, Cout, H+2, W+2); the module's
             default (`torch.ones(...) + 0.01`) is folded in as the constant
             1.01.
    Returns (N, Cout, H+2, W+2) float32.
    """
    if weight.ndim == 4:          # PyTorch Conv2d weight layout (Cout,Cin,1,1)
        weight = weight[:, :, 0, 0]

    n, cin, h, w = x_nchw.shape
    cout = weight.shape[0]
    hp, wp = h + 2, w + 2

    has_other = other is not None
    other_const = 0.0 if has_other else 1.01
    # TODO(synk): `padding1 = torch.randn(v1.shape)` in the PyTorch forward is
    # dead code (computed, never used), so it is intentionally not reproduced.

    tr = _pick_row_tile(h)
    nr = h // tr
    grid = (n, nr)

    x_f32 = x_nchw.astype(jnp.float32)                  # native NCHW, no reshape
    w_mat = weight.astype(jnp.float32)                  # (Cout, Cin)
    b_col = bias.reshape(cout, 1).astype(jnp.float32)   # (Cout, 1)

    in_specs = [
        pl.BlockSpec((1, cin, tr, w), lambda b, r: (b, 0, r, 0)),
        pl.BlockSpec((cout, cin), lambda b, r: (0, 0)),
        pl.BlockSpec((cout, 1), lambda b, r: (0, 0)),
    ]
    operands = [x_f32, w_mat, b_col]
    if has_other:
        other_full = jnp.broadcast_to(
            jnp.asarray(other, jnp.float32), (n, cout, hp, wp))
        in_specs.append(
            pl.BlockSpec((1, cout, hp, wp), lambda b, r: (b, 0, 0, 0)))
        operands.append(other_full)

    out_specs = pl.BlockSpec((1, cout, hp, wp), lambda b, r: (b, 0, 0, 0))

    # Double-buffered VMEM footprint of the chosen blocks; only bump the scoped
    # VMEM limit when a large spatial size needs it (leave defaults otherwise).
    # TODO(synk): for spatial sizes where the per-batch padded output block no
    # longer fits VMEM (H*W >~ 500k on v7x) this would need row-disjoint output
    # tiling instead of a resident block.
    block_bytes = 4 * (2 * cin * tr * w
                       + (4 if has_other else 2) * cout * hp * wp
                       + 2 * (cout * cin + cout))
    vmem_limit = None
    if block_bytes > 12 * 1024 * 1024:
        vmem_limit = min(int(1.5 * block_bytes), 64 * 1024 * 1024)

    cost = pl.CostEstimate(
        flops=2 * n * cout * cin * h * w,
        transcendentals=n * cout * (h * w + 1),
        bytes_accessed=4 * (n * cin * h * w + cout * cin + cout
                            + (2 if has_other else 1) * n * cout * hp * wp),
    )

    return pl.pallas_call(
        functools.partial(_conv1x1_sigmoid_pad_kernel,
                          other_const=other_const, has_other=has_other),
        out_shape=jax.ShapeDtypeStruct((n, cout, hp, wp), jnp.float32),
        grid_spec=pltpu.PrefetchScalarGridSpec(
            num_scalar_prefetch=0,
            grid=grid,
            in_specs=in_specs,
            out_specs=out_specs,
        ),
        compiler_params=pltpu.CompilerParams(
            # The padded output block is revisited across the row-tile axis
            # (accumulator pattern) -> that axis must be "arbitrary"; batch
            # stays "parallel".
            dimension_semantics=("parallel", "arbitrary"),
            vmem_limit_bytes=vmem_limit,
        ),
        cost_estimate=cost,
    )(*operands)


if __name__ == "__main__":
    key = jax.random.PRNGKey(0)
    k_x, k_w, k_b, k_o = jax.random.split(key, 4)

    # Small shapes consistent with the module: channels fixed to 16 by the
    # conv; spatial 16x16 -> padded conv output 18x18; batch 2.
    N, C, H, W = 2, 16, 16, 16
    x1 = jax.random.normal(k_x, (N, C, H, W), jnp.float32)

    # Deterministic Conv2d(16, 16, 1) parameters in PyTorch layout.
    fan_in = C * 1 * 1
    bound = 1.0 / (fan_in ** 0.5)
    weight = jax.random.uniform(k_w, (C, C, 1, 1), jnp.float32, -bound, bound)
    bias = jax.random.uniform(k_b, (C,), jnp.float32, -bound, bound)

    # Default `other` path (constant 1.01 folded into the kernel).
    out = model_forward(x1, weight, bias)
    jax.block_until_ready(out)
    assert out.shape == (N, C, H + 2, W + 2), out.shape

    # Pure-JAX reference of the same computation.
    w2 = weight[:, :, 0, 0]
    conv = jnp.einsum("oc,nchw->nohw", w2, x1,
                      precision=jax.lax.Precision.HIGHEST,
                      preferred_element_type=jnp.float32)
    conv = jnp.pad(conv, ((0, 0), (0, 0), (1, 1), (1, 1)))
    conv = conv + bias[None, :, None, None]
    ref = jax.nn.sigmoid(conv) + 1.01
    assert jnp.allclose(out, ref, atol=1e-3, rtol=1e-3), "default-other mismatch"

    # Explicit `other` path (fused into the kernel as an extra input).
    other = 0.25 + 0.5 * jax.random.uniform(k_o, (1, C, H + 2, W + 2), jnp.float32)
    out2 = model_forward(x1, weight, bias, other=other)
    jax.block_until_ready(out2)
    ref2 = jax.nn.sigmoid(conv) + other
    assert jnp.allclose(out2, ref2, atol=1e-3, rtol=1e-3), "explicit-other mismatch"

    print("KERNEL_OK")
</pallas_src>

<mosaic_0001>
module attributes {stable_mosaic.version = 11 : i64} {
  func.func @_conv1x1_sigmoid_pad_kernel(%arg0: i32, %arg1: i32, %arg2: memref<1x16x8x16xf32, #tpu.memory_space<vmem>>, %arg3: memref<16x16xf32, #tpu.memory_space<vmem>>, %arg4: memref<16x1xf32, #tpu.memory_space<vmem>>, %arg5: memref<1x16x18x18xf32, #tpu.memory_space<vmem>>) attributes {dimension_semantics = [#tpu.dimension_semantics<parallel>, #tpu.dimension_semantics<arbitrary>], iteration_bounds = array<i64: 2, 2>, scalar_prefetch = 0 : i64, scratch_operands = 0 : i64, tpu.core_type = #tpu.core_type<tc>, window_params = [{transform_indices = @transform_0, window_bounds = array<i64: 1, 16, 8, 16>}, {pipeline_mode = #tpu.pipeline_mode<synchronous>, transform_indices = @transform_1, window_bounds = array<i64: 16, 16>}, {pipeline_mode = #tpu.pipeline_mode<synchronous>, transform_indices = @transform_2, window_bounds = array<i64: 16, 1>}, {transform_indices = @transform_3, window_bounds = array<i64: 1, 16, 18, 18>}]} {
    %c0_i32 = arith.constant 0 : i32
    %0 = arith.cmpi eq, %arg1, %c0_i32 : i32
    %1 = arith.extui %0 : i1 to i32
    %c0_i32_0 = arith.constant 0 : i32
    %2 = arith.cmpi ne, %1, %c0_i32_0 : i32
    scf.if %2 {
      %c0_92 = arith.constant 0 : index
      %c0_93 = arith.constant 0 : index
      %165 = vector.load %arg4[%c0_92, %c0_93] : memref<16x1xf32, #tpu.memory_space<vmem>>, vector<16x1xf32>
      %166 = arith.negf %165 : vector<16x1xf32>
      %167 = math.exp %166 : vector<16x1xf32>
      %cst_94 = arith.constant 1.000000e+00 : f32
      %168 = vector.broadcast %cst_94 : f32 to vector<16x1xf32>
      %169 = arith.addf %168, %167 : vector<16x1xf32>
      %170 = arith.divf %168, %169 : vector<16x1xf32>
      %171 = vector.shape_cast %170 : vector<16x1xf32> to vector<16x1x1xf32>
      %172 = vector.shape_cast %171 : vector<16x1x1xf32> to vector<16x1x1xf32>
      %173 = vector.broadcast %172 : vector<16x1x1xf32> to vector<16x18x18xf32>
      %cst_95 = arith.constant 1.010000e+00 : f32
      %174 = vector.broadcast %cst_95 : f32 to vector<16x18x18xf32>
      %175 = arith.addf %173, %174 : vector<16x18x18xf32>
      %c0_96 = arith.constant 0 : index
      %c0_97 = arith.constant 0 : index
      %c0_98 = arith.constant 0 : index
      %c0_99 = arith.constant 0 : index
      %176 = vector.load %arg5[%c0_96, %c0_97, %c0_98, %c0_99] : memref<1x16x18x18xf32, #tpu.memory_space<vmem>>, vector<1x16x18x18xf32>
      %177 = vector.shape_cast %176 : vector<1x16x18x18xf32> to vector<16x18x18xf32>
      %178 = vector.shape_cast %175 : vector<16x18x18xf32> to vector<1x16x18x18xf32>
      tpu.vector_store %arg5[%c0_96, %c0_97, %c0_98, %c0_99], %178 {strides = array<i32>} : memref<1x16x18x18xf32, #tpu.memory_space<vmem>>, vector<1x16x18x18xf32>,
    } else {
    }
    %c0 = arith.constant 0 : index
    %c0_1 = arith.constant 0 : index
    %3 = vector.load %arg3[%c0, %c0_1] : memref<16x16xf32, #tpu.memory_space<vmem>>, vector<16x16xf32>
    %c0_2 = arith.constant 0 : index
    %c0_3 = arith.constant 0 : index
    %4 = vector.load %arg4[%c0_2, %c0_3] : memref<16x1xf32, #tpu.memory_space<vmem>>, vector<16x1xf32>
    %c0_4 = arith.constant 0 : index
    %c0_5 = arith.constant 0 : index
    %c0_6 = arith.constant 0 : index
    %c0_7 = arith.constant 0 : index
    %5 = vector.load %arg2[%c0_4, %c0_5, %c0_6, %c0_7] : memref<1x16x8x16xf32, #tpu.memory_space<vmem>>, vector<1x16x1x16xf32>
    %6 = vector.shape_cast %5 : vector<1x16x1x16xf32> to vector<16x16xf32>
    %cst = arith.constant dense<0.000000e+00> : vector<16x16xf32>
    %7 = tpu.matmul %3, %6, %cst {dimension_numbers = #tpu.dot_dimension_numbers<[1], [0], [0], [1], [0, 0, 1, 1], [], []>} : vector<16x16xf32>, vector<16x16xf32>, vector<16x16xf32> -> vector<16x16xf32>
    %8 = vector.broadcast %4 : vector<16x1xf32> to vector<16x16xf32>
    %9 = arith.addf %7, %8 : vector<16x16xf32>
    %10 = arith.negf %9 : vector<16x16xf32>
    %11 = math.exp %10 : vector<16x16xf32>
    %cst_8 = arith.constant 1.000000e+00 : f32
    %12 = vector.broadcast %cst_8 : f32 to vector<16x16xf32>
    %13 = arith.addf %12, %11 : vector<16x16xf32>
    %14 = arith.divf %12, %13 : vector<16x16xf32>
    %15 = vector.shape_cast %14 : vector<16x16xf32> to vector<16x1x16xf32>
    %c8_i32 = arith.constant 8 : i32
    %16 = arith.muli %arg1, %c8_i32 : i32
    %c1_i32 = arith.constant 1 : i32
    %17 = arith.addi %c1_i32, %16 : i32
    %c0_i32_9 = arith.constant 0 : i32
    %18 = arith.addi %17, %c0_i32_9 : i32
    %cst_10 = arith.constant 1.010000e+00 : f32
    %19 = vector.broadcast %cst_10 : f32 to vector<16x1x16xf32>
    %20 = arith.addf %15, %19 : vector<16x1x16xf32>
    %c0_11 = arith.constant 0 : index
    %c0_12 = arith.constant 0 : index
    %21 = arith.index_cast %18 : i32 to index
    %c1 = arith.constant 1 : index
    %22 = vector.load %arg5[%c0_11, %c0_12, %21, %c1] : memref<1x16x18x18xf32, #tpu.memory_space<vmem>>, vector<1x16x1x16xf32>
    %23 = vector.shape_cast %22 : vector<1x16x1x16xf32> to vector<16x1x16xf32>
    %24 = vector.shape_cast %20 : vector<16x1x16xf32> to vector<1x16x1x16xf32>
    tpu.vector_store %arg5[%c0_11, %c0_12, %21, %c1], %24 {strides = array<i32>} : memref<1x16x18x18xf32, #tpu.memory_space<vmem>>, vector<1x16x1x16xf32>,
    %c0_13 = arith.constant 0 : index
    %c0_14 = arith.constant 0 : index
    %c1_15 = arith.constant 1 : index
    %c0_16 = arith.constant 0 : index
    %25 = vector.load %arg2[%c0_13, %c0_14, %c1_15, %c0_16] : memref<1x16x8x16xf32, #tpu.memory_space<vmem>>, vector<1x16x1x16xf32>
    %26 = vector.shape_cast %25 : vector<1x16x1x16xf32> to vector<16x16xf32>
    %cst_17 = arith.constant dense<0.000000e+00> : vector<16x16xf32>
    %27 = tpu.matmul %3, %26, %cst_17 {dimension_numbers = #tpu.dot_dimension_numbers<[1], [0], [0], [1], [0, 0, 1, 1], [], []>} : vector<16x16xf32>, vector<16x16xf32>, vector<16x16xf32> -> vector<16x16xf32>
    %28 = vector.broadcast %4 : vector<16x1xf32> to vector<16x16xf32>
    %29 = arith.addf %27, %28 : vector<16x16xf32>
    %30 = arith.negf %29 : vector<16x16xf32>
    %31 = math.exp %30 : vector<16x16xf32>
    %cst_18 = arith.constant 1.000000e+00 : f32
    %32 = vector.broadcast %cst_18 : f32 to vector<16x16xf32>
    %33 = arith.addf %32, %31 : vector<16x16xf32>
    %34 = arith.divf %32, %33 : vector<16x16xf32>
    %35 = vector.shape_cast %34 : vector<16x16xf32> to vector<16x1x16xf32>
    %c8_i32_19 = arith.constant 8 : i32
    %36 = arith.muli %arg1, %c8_i32_19 : i32
    %c1_i32_20 = arith.constant 1 : i32
    %37 = arith.addi %c1_i32_20, %36 : i32
    %c1_i32_21 = arith.constant 1 : i32
    %38 = arith.addi %37, %c1_i32_21 : i32
    %cst_22 = arith.constant 1.010000e+00 : f32
    %39 = vector.broadcast %cst_22 : f32 to vector<16x1x16xf32>
    %40 = arith.addf %35, %39 : vector<16x1x16xf32>
    %c0_23 = arith.constant 0 : index
    %c0_24 = arith.constant 0 : index
    %41 = arith.index_cast %38 : i32 to index
    %c1_25 = arith.constant 1 : index
    %42 = vector.load %arg5[%c0_23, %c0_24, %41, %c1_25] : memref<1x16x18x18xf32, #tpu.memory_space<vmem>>, vector<1x16x1x16xf32>
    %43 = vector.shape_cast %42 : vector<1x16x1x16xf32> to vector<16x1x16xf32>
    %44 = vector.shape_cast %40 : vector<16x1x16xf32> to vector<1x16x1x16xf32>
    tpu.vector_store %arg5[%c0_23, %c0_24, %41, %c1_25], %44 {strides = array<i32>} : memref<1x16x18x18xf32, #tpu.memory_space<vmem>>, vector<1x16x1x16xf32>,
    %c0_26 = arith.constant 0 : index
    %c0_27 = arith.constant 0 : index
    %c2 = arith.constant 2 : index
    %c0_28 = arith.constant 0 : index
    %45 = vector.load %arg2[%c0_26, %c0_27, %c2, %c0_28] : memref<1x16x8x16xf32, #tpu.memory_space<vmem>>, vector<1x16x1x16xf32>
    %46 = vector.shape_cast %45 : vector<1x16x1x16xf32> to vector<16x16xf32>
    %cst_29 = arith.constant dense<0.000000e+00> : vector<16x16xf32>
    %47 = tpu.matmul %3, %46, %cst_29 {dimension_numbers = #tpu.dot_dimension_numbers<[1], [0], [0], [1], [0, 0, 1, 1], [], []>} : vector<16x16xf32>, vector<16x16xf32>, vector<16x16xf32> -> vector<16x16xf32>
    %48 = vector.broadcast %4 : vector<16x1xf32> to vector<16x16xf32>
    %49 = arith.addf %47, %48 : vector<16x16xf32>
    %50 = arith.negf %49 : vector<16x16xf32>
    %51 = math.exp %50 : vector<16x16xf32>
    %cst_30 = arith.constant 1.000000e+00 : f32
    %52 = vector.broadcast %cst_30 : f32 to vector<16x16xf32>
    %53 = arith.addf %52, %51 : vector<16x16xf32>
    %54 = arith.divf %52, %53 : vector<16x16xf32>
    %55 = vector.shape_cast %54 : vector<16x16xf32> to vector<16x1x16xf32>
    %c8_i32_31 = arith.constant 8 : i32
    %56 = arith.muli %arg1, %c8_i32_31 : i32
    %c1_i32_32 = arith.constant 1 : i32
    %57 = arith.addi %c1_i32_32, %56 : i32
    %c2_i32 = arith.constant 2 : i32
    %58 = arith.addi %57, %c2_i32 : i32
    %cst_33 = arith.constant 1.010000e+00 : f32
    %59 = vector.broadcast %cst_33 : f32 to vector<16x1x16xf32>
    %60 = arith.addf %55, %59 : vector<16x1x16xf32>
    %c0_34 = arith.constant 0 : index
    %c0_35 = arith.constant 0 : index
    %61 = arith.index_cast %58 : i32 to index
    %c1_36 = arith.constant 1 : index
    %62 = vector.load %arg5[%c0_34, %c0_35, %61, %c1_36] : memref<1x16x18x18xf32, #tpu.memory_space<vmem>>, vector<1x16x1x16xf32>
    %63 = vector.shape_cast %62 : vector<1x16x1x16xf32> to vector<16x1x16xf32>
    %64 = vector.shape_cast %60 : vector<16x1x16xf32> to vector<1x16x1x16xf32>
    tpu.vector_store %arg5[%c0_34, %c0_35, %61, %c1_36], %64 {strides = array<i32>} : memref<1x16x18x18xf32, #tpu.memory_space<vmem>>, vector<1x16x1x16xf32>,
    %c0_37 = arith.constant 0 : index
    %c0_38 = arith.constant 0 : index
    %c3 = arith.constant 3 : index
    %c0_39 = arith.constant 0 : index
    %65 = vector.load %arg2[%c0_37, %c0_38, %c3, %c0_39] : memref<1x16x8x16xf32, #tpu.memory_space<vmem>>, vector<1x16x1x16xf32>
    %66 = vector.shape_cast %65 : vector<1x16x1x16xf32> to vector<16x16xf32>
    %cst_40 = arith.constant dense<0.000000e+00> : vector<16x16xf32>
    %67 = tpu.matmul %3, %66, %cst_40 {dimension_numbers = #tpu.dot_dimension_numbers<[1], [0], [0], [1], [0, 0, 1, 1], [], []>} : vector<16x16xf32>, vector<16x16xf32>, vector<16x16xf32> -> vector<16x16xf32>
    %68 = vector.broadcast %4 : vector<16x1xf32> to vector<16x16xf32>
    %69 = arith.addf %67, %68 : vector<16x16xf32>
    %70 = arith.negf %69 : vector<16x16xf32>
    %71 = math.exp %70 : vector<16x16xf32>
    %cst_41 = arith.constant 1.000000e+00 : f32
    %72 = vector.broadcast %cst_41 : f32 to vector<16x16xf32>
    %73 = arith.addf %72, %71 : vector<16x16xf32>
    %74 = arith.divf %72, %73 : vector<16x16xf32>
    %75 = vector.shape_cast %74 : vector<16x16xf32> to vector<16x1x16xf32>
    %c8_i32_42 = arith.constant 8 : i32
    %76 = arith.muli %arg1, %c8_i32_42 : i32
    %c1_i32_43 = arith.constant 1 : i32
    %77 = arith.addi %c1_i32_43, %76 : i32
    %c3_i32 = arith.constant 3 : i32
    %78 = arith.addi %77, %c3_i32 : i32
    %cst_44 = arith.constant 1.010000e+00 : f32
    %79 = vector.broadcast %cst_44 : f32 to vector<16x1x16xf32>
    %80 = arith.addf %75, %79 : vector<16x1x16xf32>
    %c0_45 = arith.constant 0 : index
    %c0_46 = arith.constant 0 : index
    %81 = arith.index_cast %78 : i32 to index
    %c1_47 = arith.constant 1 : index
    %82 = vector.load %arg5[%c0_45, %c0_46, %81, %c1_47] : memref<1x16x18x18xf32, #tpu.memory_space<vmem>>, vector<1x16x1x16xf32>
    %83 = vector.shape_cast %82 : vector<1x16x1x16xf32> to vector<16x1x16xf32>
    %84 = vector.shape_cast %80 : vector<16x1x16xf32> to vector<1x16x1x16xf32>
    tpu.vector_store %arg5[%c0_45, %c0_46, %81, %c1_47], %84 {strides = array<i32>} : memref<1x16x18x18xf32, #tpu.memory_space<vmem>>, vector<1x16x1x16xf32>,
    %c0_48 = arith.constant 0 : index
    %c0_49 = arith.constant 0 : index
    %c4 = arith.constant 4 : index
    %c0_50 = arith.constant 0 : index
    %85 = vector.load %arg2[%c0_48, %c0_49, %c4, %c0_50] : memref<1x16x8x16xf32, #tpu.memory_space<vmem>>, vector<1x16x1x16xf32>
    %86 = vector.shape_cast %85 : vector<1x16x1x16xf32> to vector<16x16xf32>
    %cst_51 = arith.constant dense<0.000000e+00> : vector<16x16xf32>
    %87 = tpu.matmul %3, %86, %cst_51 {dimension_numbers = #tpu.dot_dimension_numbers<[1], [0], [0], [1], [0, 0, 1, 1], [], []>} : vector<16x16xf32>, vector<16x16xf32>, vector<16x16xf32> -> vector<16x16xf32>
    %88 = vector.broadcast %4 : vector<16x1xf32> to vector<16x16xf32>
    %89 = arith.addf %87, %88 : vector<16x16xf32>
    %90 = arith.negf %89 : vector<16x16xf32>
    %91 = math.exp %90 : vector<16x16xf32>
    %cst_52 = arith.constant 1.000000e+00 : f32
    %92 = vector.broadcast %cst_52 : f32 to vector<16x16xf32>
    %93 = arith.addf %92, %91 : vector<16x16xf32>
    %94 = arith.divf %92, %93 : vector<16x16xf32>
    %95 = vector.shape_cast %94 : vector<16x16xf32> to vector<16x1x16xf32>
    %c8_i32_53 = arith.constant 8 : i32
    %96 = arith.muli %arg1, %c8_i32_53 : i32
    %c1_i32_54 = arith.constant 1 : i32
    %97 = arith.addi %c1_i32_54, %96 : i32
    %c4_i32 = arith.constant 4 : i32
    %98 = arith.addi %97, %c4_i32 : i32
    %cst_55 = arith.constant 1.010000e+00 : f32
    %99 = vector.broadcast %cst_55 : f32 to vector<16x1x16xf32>
    %100 = arith.addf %95, %99 : vector<16x1x16xf32>
    %c0_56 = arith.constant 0 : index
    %c0_57 = arith.constant 0 : index
    %101 = arith.index_cast %98 : i32 to index
    %c1_58 = arith.constant 1 : index
    %102 = vector.load %arg5[%c0_56, %c0_57, %101, %c1_58] : memref<1x16x18x18xf32, #tpu.memory_space<vmem>>, vector<1x16x1x16xf32>
    %103 = vector.shape_cast %102 : vector<1x16x1x16xf32> to vector<16x1x16xf32>
    %104 = vector.shape_cast %100 : vector<16x1x16xf32> to vector<1x16x1x16xf32>
    tpu.vector_store %arg5[%c0_56, %c0_57, %101, %c1_58], %104 {strides = array<i32>} : memref<1x16x18x18xf32, #tpu.memory_space<vmem>>, vector<1x16x1x16xf32>,
    %c0_59 = arith.constant 0 : index
    %c0_60 = arith.constant 0 : index
    %c5 = arith.constant 5 : index
    %c0_61 = arith.constant 0 : index
    %105 = vector.load %arg2[%c0_59, %c0_60, %c5, %c0_61] : memref<1x16x8x16xf32, #tpu.memory_space<vmem>>, vector<1x16x1x16xf32>
    %106 = vector.shape_cast %105 : vector<1x16x1x16xf32> to vector<16x16xf32>
    %cst_62 = arith.constant dense<0.000000e+00> : vector<16x16xf32>
    %107 = tpu.matmul %3, %106, %cst_62 {dimension_numbers = #tpu.dot_dimension_numbers<[1], [0], [0], [1], [0, 0, 1, 1], [], []>} : vector<16x16xf32>, vector<16x16xf32>, vector<16x16xf32> -> vector<16x16xf32>
    %108 = vector.broadcast %4 : vector<16x1xf32> to vector<16x16xf32>
    %109 = arith.addf %107, %108 : vector<16x16xf32>
    %110 = arith.negf %109 : vector<16x16xf32>
    %111 = math.exp %110 : vector<16x16xf32>
    %cst_63 = arith.constant 1.000000e+00 : f32
    %112 = vector.broadcast %cst_63 : f32 to vector<16x16xf32>
    %113 = arith.addf %112, %111 : vector<16x16xf32>
    %114 = arith.divf %112, %113 : vector<16x16xf32>
    %115 = vector.shape_cast %114 : vector<16x16xf32> to vector<16x1x16xf32>
    %c8_i32_64 = arith.constant 8 : i32
    %116 = arith.muli %arg1, %c8_i32_64 : i32
    %c1_i32_65 = arith.constant 1 : i32
    %117 = arith.addi %c1_i32_65, %116 : i32
    %c5_i32 = arith.constant 5 : i32
    %118 = arith.addi %117, %c5_i32 : i32
    %cst_66 = arith.constant 1.010000e+00 : f32
    %119 = vector.broadcast %cst_66 : f32 to vector<16x1x16xf32>
    %120 = arith.addf %115, %119 : vector<16x1x16xf32>
    %c0_67 = arith.constant 0 : index
    %c0_68 = arith.constant 0 : index
    %121 = arith.index_cast %118 : i32 to index
    %c1_69 = arith.constant 1 : index
    %122 = vector.load %arg5[%c0_67, %c0_68, %121, %c1_69] : memref<1x16x18x18xf32, #tpu.memory_space<vmem>>, vector<1x16x1x16xf32>
    %123 = vector.shape_cast %122 : vector<1x16x1x16xf32> to vector<16x1x16xf32>
    %124 = vector.shape_cast %120 : vector<16x1x16xf32> to vector<1x16x1x16xf32>
    tpu.vector_store %arg5[%c0_67, %c0_68, %121, %c1_69], %124 {strides = array<i32>} : memref<1x16x18x18xf32, #tpu.memory_space<vmem>>, vector<1x16x1x16xf32>,
    %c0_70 = arith.constant 0 : index
    %c0_71 = arith.constant 0 : index
    %c6 = arith.constant 6 : index
    %c0_72 = arith.constant 0 : index
    %125 = vector.load %arg2[%c0_70, %c0_71, %c6, %c0_72] : memref<1x16x8x16xf32, #tpu.memory_space<vmem>>, vector<1x16x1x16xf32>
    %126 = vector.shape_cast %125 : vector<1x16x1x16xf32> to vector<16x16xf32>
    %cst_73 = arith.constant dense<0.000000e+00> : vector<16x16xf32>
    %127 = tpu.matmul %3, %126, %cst_73 {dimension_numbers = #tpu.dot_dimension_numbers<[1], [0], [0], [1], [0, 0, 1, 1], [], []>} : vector<16x16xf32>, vector<16x16xf32>, vector<16x16xf32> -> vector<16x16xf32>
    %128 = vector.broadcast %4 : vector<16x1xf32> to vector<16x16xf32>
    %129 = arith.addf %127, %128 : vector<16x16xf32>
    %130 = arith.negf %129 : vector<16x16xf32>
    %131 = math.exp %130 : vector<16x16xf32>
    %cst_74 = arith.constant 1.000000e+00 : f32
    %132 = vector.broadcast %cst_74 : f32 to vector<16x16xf32>
    %133 = arith.addf %132, %131 : vector<16x16xf32>
    %134 = arith.divf %132, %133 : vector<16x16xf32>
    %135 = vector.shape_cast %134 : vector<16x16xf32> to vector<16x1x16xf32>
    %c8_i32_75 = arith.constant 8 : i32
    %136 = arith.muli %arg1, %c8_i32_75 : i32
    %c1_i32_76 = arith.constant 1 : i32
    %137 = arith.addi %c1_i32_76, %136 : i32
    %c6_i32 = arith.constant 6 : i32
    %138 = arith.addi %137, %c6_i32 : i32
    %cst_77 = arith.constant 1.010000e+00 : f32
    %139 = vector.broadcast %cst_77 : f32 to vector<16x1x16xf32>
    %140 = arith.addf %135, %139 : vector<16x1x16xf32>
    %c0_78 = arith.constant 0 : index
    %c0_79 = arith.constant 0 : index
    %141 = arith.index_cast %138 : i32 to index
    %c1_80 = arith.constant 1 : index
    %142 = vector.load %arg5[%c0_78, %c0_79, %141, %c1_80] : memref<1x16x18x18xf32, #tpu.memory_space<vmem>>, vector<1x16x1x16xf32>
    %143 = vector.shape_cast %142 : vector<1x16x1x16xf32> to vector<16x1x16xf32>
    %144 = vector.shape_cast %140 : vector<16x1x16xf32> to vector<1x16x1x16xf32>
    tpu.vector_store %arg5[%c0_78, %c0_79, %141, %c1_80], %144 {strides = array<i32>} : memref<1x16x18x18xf32, #tpu.memory_space<vmem>>, vector<1x16x1x16xf32>,
    %c0_81 = arith.constant 0 : index
    %c0_82 = arith.constant 0 : index
    %c7 = arith.constant 7 : index
    %c0_83 = arith.constant 0 : index
    %145 = vector.load %arg2[%c0_81, %c0_82, %c7, %c0_83] : memref<1x16x8x16xf32, #tpu.memory_space<vmem>>, vector<1x16x1x16xf32>
    %146 = vector.shape_cast %145 : vector<1x16x1x16xf32> to vector<16x16xf32>
    %cst_84 = arith.constant dense<0.000000e+00> : vector<16x16xf32>
    %147 = tpu.matmul %3, %146, %cst_84 {dimension_numbers = #tpu.dot_dimension_numbers<[1], [0], [0], [1], [0, 0, 1, 1], [], []>} : vector<16x16xf32>, vector<16x16xf32>, vector<16x16xf32> -> vector<16x16xf32>
    %148 = vector.broadcast %4 : vector<16x1xf32> to vector<16x16xf32>
    %149 = arith.addf %147, %148 : vector<16x16xf32>
    %150 = arith.negf %149 : vector<16x16xf32>
    %151 = math.exp %150 : vector<16x16xf32>
    %cst_85 = arith.constant 1.000000e+00 : f32
    %152 = vector.broadcast %cst_85 : f32 to vector<16x16xf32>
    %153 = arith.addf %152, %151 : vector<16x16xf32>
    %154 = arith.divf %152, %153 : vector<16x16xf32>
    %155 = vector.shape_cast %154 : vector<16x16xf32> to vector<16x1x16xf32>
    %c8_i32_86 = arith.constant 8 : i32
    %156 = arith.muli %arg1, %c8_i32_86 : i32
    %c1_i32_87 = arith.constant 1 : i32
    %157 = arith.addi %c1_i32_87, %156 : i32
    %c7_i32 = arith.constant 7 : i32
    %158 = arith.addi %157, %c7_i32 : i32
    %cst_88 = arith.constant 1.010000e+00 : f32
    %159 = vector.broadcast %cst_88 : f32 to vector<16x1x16xf32>
    %160 = arith.addf %155, %159 : vector<16x1x16xf32>
    %c0_89 = arith.constant 0 : index
    %c0_90 = arith.constant 0 : index
    %161 = arith.index_cast %158 : i32 to index
    %c1_91 = arith.constant 1 : index
    %162 = vector.load %arg5[%c0_89, %c0_90, %161, %c1_91] : memref<1x16x18x18xf32, #tpu.memory_space<vmem>>, vector<1x16x1x16xf32>
    %163 = vector.shape_cast %162 : vector<1x16x1x16xf32> to vector<16x1x16xf32>
    %164 = vector.shape_cast %160 : vector<16x1x16xf32> to vector<1x16x1x16xf32>
    tpu.vector_store %arg5[%c0_89, %c0_90, %161, %c1_91], %164 {strides = array<i32>} : memref<1x16x18x18xf32, #tpu.memory_space<vmem>>, vector<1x16x1x16xf32>,
    return
  }
  func.func @transform_0(%arg0: i32, %arg1: i32) -> (i32, i32, i32, i32) {
    %c0_i32 = arith.constant 0 : i32
    %c0_i32_0 = arith.constant 0 : i32
    %c0_i32_1 = arith.constant 0 : i32
    return %arg0, %c0_i32, %arg1, %c0_i32_0 : i32, i32, i32, i32
  }
  func.func @transform_1(%arg0: i32, %arg1: i32) -> (i32, i32) {
    %c0_i32 = arith.constant 0 : i32
    %c0_i32_0 = arith.constant 0 : i32
    %c0_i32_1 = arith.constant 0 : i32
    return %c0_i32, %c0_i32_0 : i32, i32
  }
  func.func @transform_2(%arg0: i32, %arg1: i32) -> (i32, i32) {
    %c0_i32 = arith.constant 0 : i32
    %c0_i32_0 = arith.constant 0 : i32
    %c0_i32_1 = arith.constant 0 : i32
    return %c0_i32, %c0_i32_0 : i32, i32
  }
  func.func @transform_3(%arg0: i32, %arg1: i32) -> (i32, i32, i32, i32) {
    %c0_i32 = arith.constant 0 : i32
    %c0_i32_0 = arith.constant 0 : i32
    %c0_i32_1 = arith.constant 0 : i32
    %c0_i32_2 = arith.constant 0 : i32
    return %arg0, %c0_i32, %c0_i32_0, %c0_i32_1 : i32, i32, i32, i32
  }
}

</mosaic_0001>

<bundles_post_ra>
// kernel: tpu_custom_call.1
= control target key start
LH: loop header
LB: loop body
LE: loop exit
PB: predicated region body
PF: predicated region fallthrough
CT: control target
= control target key end

     0   :  { %8 = vsyncpa [#allocation3], 0  ;;  %s4425_s0 = inlined_call_operand.hbm [shape: f32[2,16,16,16], index: 0, kind: input, shape index: {}]   ;;  %s4426_s1 = inlined_call_operand.vmem [shape: f32[16,16], index: 1, kind: input, shape index: {}]   ;;  %s4427_s2 = inlined_call_operand.vmem [shape: f32[16,1], index: 2, kind: input, shape index: {}]   ;;  %s4428_s3 = inlined_call_operand.vmem [shape: f32[2,16,18,18], index: 3, kind: output, shape index: {}]  }
   0x1   :  { %10 = vsyncpa [#allocation3 + $0x1], 0  ;;  %s3145_s12 = smov 0   ;;  %s3147_s13 = smov 0  }
   0x2   :  { %s3149_s14 = smov 0   ;;  %s3151_s15 = smov 0  }
   0x3   :  { %s3153_s16 = smov 0   ;;  %s3155_s17 = smov 0  }
   0x4   :  { %s3157_s18 = smov 0   ;;  %s3159_s19 = smov 0  }
   0x5 LB: > { %s2684_s20 = sadd.s32 4294967295, %s3117_s19   ;;  %s25_s21 = sadd.s32 1, %s3109_s17  ;;  %s3117_s19 = sphi %s3159_s19, %s16_s19   ;;  %s3113_s18 = sphi %s3157_s18, %s4443_s18   ;;  %s3109_s17 = sphi %s3155_s17, %s4442_s17   ;;  %s3105_s16 = sphi %s3153_s16, %s4441_s16   ;;  %s3101_s15 = sphi %s3151_s15, %s4440_s15   ;;  %s3097_s14 = sphi %s3149_s14, %s4439_s14   ;;  %s3093_s13 = sphi %s3147_s13, %s4438_s13   ;;  %s3089_s12 = sphi %s3145_s12, %s4437_s12  }
   0x6   : > { %p26_p0 = scmp.ge.s32.totalorder %s25_s21, 2  ;;  %s28_s22 = sadd.s32 1, %s3113_s18 }
   0x7   : > { %s37_s23 = sadd.s32 1, %s3097_s14  ;;  %p44_p1 = scmp.ne.s32.totalorder %s3097_s14, %s3093_s13 }
   0x8   : > { %s4445_s21 = smov (%p26_p0, %s25_s21), 0  ;;  %s4447_s22 = smov (!%p26_p0, %s28_s22), %s3113_s18 }
   0x9   : > { %s33_s24 = ssub.s32 %s3109_s17, %s4445_s21  ;;  %p45_p2 = scmp.eq.s32.totalorder %s3117_s19, 0 }
   0xa   : > { %p30_p3 = scmp.ge.s32.totalorder %s4447_s22, 2  ;;  %p50_p4 = scmp.ne.s32.totalorder %s3093_s13, %s3089_s12 }
   0xb   : > { %p3196_p5 = por %p45_p2, %p44_p1  ;;  %p51_p6 = scmp.eq.s32.totalorder %s2684_s20, 0 }
   0xc   : > { %s4449_s22 = smov (%p30_p3, %s4447_s22), 0  ;;  %p2874_p8 = scmp.lt.s32.totalorder %s3117_s19, 4 }
   0xd   : > { %p3202_p7 = por %p51_p6, %p50_p4  ;;  %s32_s27 = ssub.s32 %s3113_s18, %s4449_s22 }
   0xe   : > { %s34_s28 = sor.u32 %s33_s24, %s32_s27  ;;  %s148_s29 = sand.u32 1, %s3097_s14  }
   0xf   : > { %p35_p9 = scmp.eq.s32.totalorder %s34_s28, 0  ;;  %s2688_s30 = sshll.u32 %s148_s29, 7 }
  0x10   : > { %s2689_s4 = sshll.u32 %s3113_s18, 5  ;;  %s152_s8 = scalar_lea.vmem [#allocation2], %s2688_s30 }
  0x11   : > { %s3212_s5 = scalar_select %p35_p9, %s3097_s14, %s37_s23  }
  0x12   : > { %s156_s6 = sadd.s32 %s3109_s17, %s2689_s4  ;;  %s161_s9 = sshll.u32 %s152_s8, 4  ;;  %s162_s9 = int_to_ptr.vmem [resolvable:$true] %s161_s9 }
  0x13   : > { %s2690_s7 = sshll.u32 %s156_s6, 3  ;;  %p2871_p10 = pnand %p2874_p8, %p3196_p5 }
  0x14   : > { %s158_s12 = scalar_lea.hbm %s4425_s0, %s2690_s7  ;;  %p2691_p11 = scmp.ge.s32.totalorder %s3117_s19, 1 }
  0x15   : > { %s159_s20 = sshll.u32 %s158_s12, 4  ;;  %s149_s24 = scalar_lea.sflag [#allocation3], %s148_s29  ;;  %s160_s20 = int_to_ptr.hbm [resolvable:$true] %s159_s20 }
  0x16   : > { %s3119_s27 = smov 256   ;;  %s3120_s23 = smov 128  }
  0x17   : > { %s3121_s28 = smov 8   ;;  %p169_p12 = scmp.lt.s32.totalorder %s3117_s19, 5 }
  0x18   : > { %2873 = dma.hbm_to_vmem [thread:$0]  (!%p2871_p10), %s160_s20, 2048, %s162_s9, %s149_s24, %s3119_s27, %s3120_s23, %s3121_s28  }
  0x19   : > { %p170_p13 = pnand %p2691_p11, %p169_p12 }
  0x1a   : > { %s175_s30 = sand.u32 (!%p170_p13), 1, %s3093_s13  }
  0x1b   : > { %173 = sbr.rel (%p170_p13) target bundleno = 873 (0x369), region = 32  ;;  %s2692_s4 = sshll.u32 (!%p170_p13), %s175_s30, 7 }
  0x1c   : > { %s176_s6 = scalar_lea.sflag (!%p170_p13), [#allocation3], %s175_s30  ;;  %s3225_s7 = scalar_lea.vmem (!%p170_p13), [#allocation2], %s2692_s4 }
  0x20   : > { %3084 = dma.done.wait (%p3202_p7), %s176_s6, 2048  }
  0x21   : > { %3086 = vsyncadd (%p3202_p7), %s176_s6, 4294965248  ;;  %p203_p0 = scmp.lt.s32.totalorder %s3105_s16, 1  ;;  %p2694_p1 = scmp.ne.s32.totalorder %s3101_s15, 0 }
  0x23   : > { %s4451_s16 = smov (!%p203_p0, %s3105_s16), 1  ;;  %211 = sbr.rel (%p2694_p1) target bundleno = 232 (0xe8), region = 40 }
  0x24   : > { %s2867_s25 = smul.u32 384, %s4451_s16 }
  0x26   : > { %s3236_s9 = scalar_lea.vmem %s4428_s3, %s2867_s25 }
  0x28   : > { %v213_v0 = vld [vmem:[%s4427_s2 + $0x8] sm:$0xff]  ;;  %v212_v1 = vld [vmem:[%s4427_s2] sm:$0xff]  ;;  %v3122_v2 = vmov 0   ;;  %vm364_vm8 = vcmask 146432   ;;  %vm367_vm9 = vcmask 140288  }
  0x29   : > { %2946 = vset.pattern.permute.xlu2 %v3122_v2  ;;  %2945 = vset.pattern.permute.xlu0 %v3122_v2  ;;  %v2696_v3 = vmul.f32 -1.442695, %v213_v0  ;;  %v2695_v4 = vmul.f32 -1.442695, %v212_v1 }
  0x2a   : > { %2947 = vset.pattern.permute.xlu1 %v3122_v2 }
  0x2b   : > { %2948 = vpow2.f32 %v2696_v3 }
  0x2c   : > { %2950 = vpow2.f32 %v2695_v4 }
  0x31   : > { %v2949_v5 = vpop.eup %2948 }
  0x32   : > { %v2951_v6 = vpop.eup %2950  ;;  %v221_v7 = vadd.f32 1.0, %v2949_v5 }
  0x33   : > { %v220_v8 = vadd.f32 1.0, %v2951_v6 }
  0x34   : > { %2952 = vrcp.f32 %v221_v7  ;;  %vm242_vm0 = vweird.f32 %v221_v7  ;;  %v248_v12 = vand.u32 2147483648, %v221_v7  ;;  %v246_v15 = vand.u32 2147483647, %v221_v7 }
  0x35   : > { %2954 = vrcp.f32 %v220_v8  ;;  %v233_v16 = vand.u32 2147483648, %v220_v8  ;;  %vm227_vm2 = vweird.f32 %v220_v8  ;;  %v231_v18 = vand.u32 2147483647, %v220_v8 }
  0x36   : > { %v249_v20 = vor.u32 1.1754944e-38, %v248_v12  ;;  %vm247_vm5 = vcmp.eq.f32.partialorder %v246_v15, 8.507059e+37 }
  0x37   : > { %v234_v23 = vor.u32 1.1754944e-38, %v233_v16  ;;  %vm232_vm7 = vcmp.eq.f32.partialorder %v231_v18, 8.507059e+37 }
  0x3a   : > { %v2953_v9 = vpop.eup %2952 }
  0x3b   : > { %v2955_v10 = vpop.eup %2954  ;;  %v238_v11 = vmul.f32 %v2953_v9, %v221_v7  ;;  %vm243_vm1 = vweird.f32 %v2953_v9 }
  0x3c   : > { %v223_v13 = vmul.f32 %v2955_v10, %v220_v8  ;;  %vm228_vm3 = vweird.f32 %v2955_v10  ;;  %vm244_vm4 = vmor %vm242_vm0, %vm243_vm1 }
  0x3d   : > { %v239_v14 = vsub.f32 1.0, %v238_v11  ;;  %vm229_vm6 = vmor %vm227_vm2, %vm228_vm3 }
  0x3e   : > { %v224_v17 = vsub.f32 1.0, %v223_v13 }
  0x3f   : > { %v240_v19 = vmul.f32 %v2953_v9, %v239_v14 }
  0x40   : > { %v225_v21 = vmul.f32 %v2955_v10, %v224_v17 }
  0x41   : > { %v241_v22 = vadd.f32 %v2953_v9, %v240_v19 }
  0x42   : > { %v226_v24 = vadd.f32 %v2955_v10, %v225_v21 }
  0x43   : > { %v245_v25 = vsel %vm244_vm4, %v2953_v9, %v241_v22 }
  0x44   : > { %v250_v26 = vsel %vm247_vm5, %v249_v20, %v245_v25  ;;  %v230_v27 = vsel %vm229_vm6, %v2955_v10, %v226_v24 }
  0x45   : > { %v276_v28 = vperm.slane %v250_v26, 0  ;;  %v235_v29 = vsel %vm232_vm7, %v234_v23, %v230_v27  ;;  %v263_v45 = vrot.slane %v250_v26, 3  ;;  %v261_v46 = vrot.slane %v250_v26, 1 }
  0x46   : > { %v268_v30 = vperm.slane %v235_v29, 0  ;;  %v255_v31 = vrot.slane %v235_v29, 2  ;;  %v257_v32 = vrot.slane %v235_v29, 4  ;;  %v254_v34 = vrot.slane %v235_v29, 1 }
  0x47   : > { %317 = vperm.xlu2 %2946, %v276_v28   ;;  %v256_v35 = vrot.slane %v235_v29, 3  ;;  %v258_v39 = vrot.slane %v235_v29, 5  ;;  %v259_v40 = vrot.slane %v235_v29, 6  ;;  %v260_v41 = vrot.slane %v235_v29, 7 }
  0x48   : > { %285 = vperm.xlu0 %2945, %v268_v30   ;;  %v270_v33 = vperm.slane %v255_v31, 0  ;;  %v272_v36 = vperm.slane %v257_v32, 0  ;;  %v269_v37 = vperm.slane %v254_v34, 0  ;;  %v262_v47 = vrot.slane %v250_v26, 2 }
  0x49   : > { %v271_v38 = vperm.slane %v256_v35, 0  ;;  %v273_v42 = vperm.slane %v258_v39, 0  ;;  %v274_v43 = vperm.slane %v259_v40, 0  ;;  %v275_v44 = vperm.slane %v260_v41, 0 }
  0x4a   : > { %293 = vperm.xlu1 %2947, %v270_v33   ;;  %v279_v48 = vperm.slane %v263_v45, 0  ;;  %v277_v49 = vperm.slane %v261_v46, 0  ;;  %v278_v50 = vperm.slane %v262_v47, 0  ;;  %v266_v51 = vrot.slane %v250_v26, 6 }
  0x4b   : > { %v264_v52 = vrot.slane %v250_v26, 4  ;;  %v265_v53 = vrot.slane %v250_v26, 5  ;;  %v267_v57 = vrot.slane %v250_v26, 7 }
  0x4c   : > { %v282_v54 = vperm.slane %v266_v51, 0 }
  0x4d   : > { %v280_v55 = vperm.slane %v264_v52, 0  ;;  %v281_v56 = vperm.slane %v265_v53, 0  ;;  %v283_v58 = vperm.slane %v267_v57, 0 }
  0x4f   : > { %301 = vperm.xlu2 %2946, %v272_v36  }
  0x50   : > { %289 = vperm.xlu0 %2945, %v269_v37  }
  0x52   : > { %297 = vperm.xlu1 %2947, %v271_v38  }
  0x57   : > { %305 = vperm.xlu2 %2946, %v273_v42  }
  0x58   : > { %309 = vperm.xlu0 %2945, %v274_v43  }
  0x5a   : > { %313 = vperm.xlu1 %2947, %v275_v44  }
  0x5f   : > { %329 = vperm.xlu2 %2946, %v279_v48  }
  0x60   : > { %321 = vperm.xlu0 %2945, %v277_v49  }
  0x62   : > { %325 = vperm.xlu1 %2947, %v278_v50  }
  0x67   : > { %341 = vperm.xlu2 %2946, %v282_v54  }
  0x68   : > { %333 = vperm.xlu0 %2945, %v280_v55  }
  0x6a   : > { %337 = vperm.xlu1 %2947, %v281_v56  }
  0x70   : > { %345 = vperm.xlu0 %2945, %v283_v58  }
  0xa1   : > { %v318_v59 = vpop.permute.xlu2 %317 }
  0xa2   : > { %v356_v60 = vadd.f32 1.01, %v318_v59 }
  0xa4   : > { %390 = vst.msk [vmem:[%s3236_s9 + $0xc0] sm:$0xff] %vm364_vm8, %v356_v60 }
  0xa5   : > { %391 = vst.msk [vmem:[%s3236_s9 + $0xc8] sm:$0xff] %vm364_vm8, %v356_v60 }
  0xa6   : > { %392 = vst.msk [vmem:[%s3236_s9 + $0xd0] sm:$0x3] %vm367_vm9, %v356_v60 }
  0xa9   : > { %v302_v61 = vpop.permute.xlu2 %301 }
  0xaa   : > { %v352_v62 = vadd.f32 1.01, %v302_v61 }
  0xac   : > { %378 = vst.msk [vmem:[%s3236_s9 + $0x60] sm:$0xff] %vm364_vm8, %v352_v62 }
  0xad   : > { %379 = vst.msk [vmem:[%s3236_s9 + $0x68] sm:$0xff] %vm364_vm8, %v352_v62 }
  0xae   : > { %380 = vst.msk [vmem:[%s3236_s9 + $0x70] sm:$0x3] %vm367_vm9, %v352_v62 }
  0xb1   : > { %v306_v63 = vpop.permute.xlu2 %305 }
  0xb2   : > { %v353_v0 = vadd.f32 1.01, %v306_v63 }
  0xb4   : > { %381 = vst.msk [vmem:[%s3236_s9 + $0x78] sm:$0xff] %vm364_vm8, %v353_v0 }
  0xb5   : > { %382 = vst.msk [vmem:[%s3236_s9 + $0x80] sm:$0xff] %vm364_vm8, %v353_v0 }
  0xb6   : > { %383 = vst.msk [vmem:[%s3236_s9 + $0x88] sm:$0x3] %vm367_vm9, %v353_v0 }
  0xb9   : > { %v330_v1 = vpop.permute.xlu2 %329 }
  0xba   : > { %v286_v2 = vpop.permute.xlu0 %285  ;;  %v359_v3 = vadd.f32 1.01, %v330_v1 }
  0xbb   : > { %v348_v4 = vadd.f32 1.01, %v286_v2 }
  0xbc   : > { %399 = vst.msk [vmem:[%s3236_s9 + $0x108] sm:$0xff] %vm364_vm8, %v359_v3  ;;  %v294_v5 = vpop.permute.xlu1 %293 }
  0xbd   : > { %365 = vst.msk [vmem:[%s3236_s9] sm:$0xff] %vm364_vm8, %v348_v4  ;;  %v350_v6 = vadd.f32 1.01, %v294_v5 }
  0xbe   : > { %366 = vst.msk [vmem:[%s3236_s9 + $0x8] sm:$0xff] %vm364_vm8, %v348_v4 }
  0xbf   : > { %368 = vst.msk [vmem:[%s3236_s9 + $0x10] sm:$0x3] %vm367_vm9, %v348_v4 }
  0xc0   : > { %400 = vst.msk [vmem:[%s3236_s9 + $0x110] sm:$0xff] %vm364_vm8, %v359_v3 }
  0xc1   : > { %401 = vst.msk [vmem:[%s3236_s9 + $0x118] sm:$0x3] %vm367_vm9, %v359_v3  ;;  %v342_v7 = vpop.permute.xlu2 %341 }
  0xc2   : > { %372 = vst.msk [vmem:[%s3236_s9 + $0x30] sm:$0xff] %vm364_vm8, %v350_v6  ;;  %v362_v8 = vadd.f32 1.01, %v342_v7  ;;  %v290_v9 = vpop.permute.xlu0 %289 }
  0xc3   : > { %373 = vst.msk [vmem:[%s3236_s9 + $0x38] sm:$0xff] %vm364_vm8, %v350_v6  ;;  %v349_v10 = vadd.f32 1.01, %v290_v9 }
  0xc4   : > { %374 = vst.msk [vmem:[%s3236_s9 + $0x40] sm:$0x3] %vm367_vm9, %v350_v6  ;;  %v298_v11 = vpop.permute.xlu1 %297 }
  0xc5   : > { %408 = vst.msk [vmem:[%s3236_s9 + $0x150] sm:$0xff] %vm364_vm8, %v362_v8  ;;  %v351_v12 = vadd.f32 1.01, %v298_v11 }
  0xc6   : > { %409 = vst.msk [vmem:[%s3236_s9 + $0x158] sm:$0xff] %vm364_vm8, %v362_v8 }
  0xc7   : > { %410 = vst.msk [vmem:[%s3236_s9 + $0x160] sm:$0x3] %vm367_vm9, %v362_v8 }
  0xc8   : > { %369 = vst.msk [vmem:[%s3236_s9 + $0x18] sm:$0xff] %vm364_vm8, %v349_v10 }
  0xc9   : > { %370 = vst.msk [vmem:[%s3236_s9 + $0x20] sm:$0xff] %vm364_vm8, %v349_v10 }
  0xca   : > { %371 = vst.msk [vmem:[%s3236_s9 + $0x28] sm:$0x3] %vm367_vm9, %v349_v10  ;;  %v310_v13 = vpop.permute.xlu0 %309 }
  0xcb   : > { %375 = vst.msk [vmem:[%s3236_s9 + $0x48] sm:$0xff] %vm364_vm8, %v351_v12  ;;  %v354_v14 = vadd.f32 1.01, %v310_v13 }
  0xcc   : > { %376 = vst.msk [vmem:[%s3236_s9 + $0x50] sm:$0xff] %vm364_vm8, %v351_v12  ;;  %v314_v15 = vpop.permute.xlu1 %313 }
  0xcd   : > { %377 = vst.msk [vmem:[%s3236_s9 + $0x58] sm:$0x3] %vm367_vm9, %v351_v12  ;;  %v355_v16 = vadd.f32 1.01, %v314_v15 }
  0xce   : > { %384 = vst.msk [vmem:[%s3236_s9 + $0x90] sm:$0xff] %vm364_vm8, %v354_v14 }
  0xcf   : > { %385 = vst.msk [vmem:[%s3236_s9 + $0x98] sm:$0xff] %vm364_vm8, %v354_v14 }
  0xd0   : > { %386 = vst.msk [vmem:[%s3236_s9 + $0xa0] sm:$0x3] %vm367_vm9, %v354_v14 }
  0xd1   : > { %387 = vst.msk [vmem:[%s3236_s9 + $0xa8] sm:$0xff] %vm364_vm8, %v355_v16 }
  0xd2   : > { %388 = vst.msk [vmem:[%s3236_s9 + $0xb0] sm:$0xff] %vm364_vm8, %v355_v16  ;;  %v322_v17 = vpop.permute.xlu0 %321 }
  0xd3   : > { %389 = vst.msk [vmem:[%s3236_s9 + $0xb8] sm:$0x3] %vm367_vm9, %v355_v16  ;;  %v357_v18 = vadd.f32 1.01, %v322_v17 }
  0xd4   : > { %v326_v19 = vpop.permute.xlu1 %325 }
  0xd5   : > { %393 = vst.msk [vmem:[%s3236_s9 + $0xd8] sm:$0xff] %vm364_vm8, %v357_v18  ;;  %v358_v20 = vadd.f32 1.01, %v326_v19 }
  0xd6   : > { %394 = vst.msk [vmem:[%s3236_s9 + $0xe0] sm:$0xff] %vm364_vm8, %v357_v18 }
  0xd7   : > { %395 = vst.msk [vmem:[%s3236_s9 + $0xe8] sm:$0x3] %vm367_vm9, %v357_v18 }
  0xd8   : > { %396 = vst.msk [vmem:[%s3236_s9 + $0xf0] sm:$0xff] %vm364_vm8, %v358_v20 }
  0xd9   : > { %397 = vst.msk [vmem:[%s3236_s9 + $0xf8] sm:$0xff] %vm364_vm8, %v358_v20 }
  0xda   : > { %398 = vst.msk [vmem:[%s3236_s9 + $0x100] sm:$0x3] %vm367_vm9, %v358_v20  ;;  %v334_v21 = vpop.permute.xlu0 %333 }
  0xdb   : > { %v360_v22 = vadd.f32 1.01, %v334_v21 }
  0xdc   : > { %v338_v23 = vpop.permute.xlu1 %337 }
  0xdd   : > { %402 = vst.msk [vmem:[%s3236_s9 + $0x120] sm:$0xff] %vm364_vm8, %v360_v22  ;;  %v361_v24 = vadd.f32 1.01, %v338_v23 }
  0xde   : > { %403 = vst.msk [vmem:[%s3236_s9 + $0x128] sm:$0xff] %vm364_vm8, %v360_v22 }
  0xdf   : > { %404 = vst.msk [vmem:[%s3236_s9 + $0x130] sm:$0x3] %vm367_vm9, %v360_v22 }
  0xe0   : > { %405 = vst.msk [vmem:[%s3236_s9 + $0x138] sm:$0xff] %vm364_vm8, %v361_v24 }
  0xe1   : > { %406 = vst.msk [vmem:[%s3236_s9 + $0x140] sm:$0xff] %vm364_vm8, %v361_v24 }
  0xe2   : > { %407 = vst.msk [vmem:[%s3236_s9 + $0x148] sm:$0x3] %vm367_vm9, %v361_v24  ;;  %v346_v25 = vpop.permute.xlu0 %345 }
  0xe3   : > { %v363_v26 = vadd.f32 1.01, %v346_v25 }
  0xe5   : > { %411 = vst.msk [vmem:[%s3236_s9 + $0x168] sm:$0xff] %vm364_vm8, %v363_v26 }
  0xe6   : > { %412 = vst.msk [vmem:[%s3236_s9 + $0x170] sm:$0xff] %vm364_vm8, %v363_v26 }
  0xe7   : > { %413 = vst.msk [vmem:[%s3236_s9 + $0x178] sm:$0x3] %vm367_vm9, %v363_v26 }
  0xe8 PF: > { %v427_v27 = vld [vmem:[%s3225_s7 + $0x48] sm:$0x1]  ;;  %v428_v28 = vld [vmem:[%s3225_s7 + $0x50] sm:$0x1]  ;;  %v429_v29 = vld [vmem:[%s3225_s7 + $0x58] sm:$0x1] }
  0xe9   : > { %v430_v30 = vld [vmem:[%s3225_s7 + $0x60] sm:$0x1]  ;;  %v431_v31 = vld [vmem:[%s3225_s7 + $0x68] sm:$0x1]  ;;  %v432_v32 = vld [vmem:[%s3225_s7 + $0x70] sm:$0x1] }
  0xea   : > { %v433_v33 = vld [vmem:[%s3225_s7 + $0x78] sm:$0x1]  ;;  %vm461_vm10 = vcmask 1041409   ;;  %vm464_vm11 = vcmask 1042434   ;;  %v426_v34 = vld [vmem:[%s3225_s7 + $0x40] sm:$0x1] }
  0xeb   : > { %vm467_vm12 = vcmask 1043459   ;;  %vm470_vm13 = vcmask 1044484   ;;  %vm473_vm14 = vcmask 1045509   ;;  %vm476_vm15 = vcmask 1046534   ;;  %v719_v38 = vld [vmem:[%s3225_s7 + $0x41] sm:$0x1] }
  0xec   : > { %vm479_vm0 = vcmask 1047559   ;;  %v481_v35 = vrot.slane %v427_v27, 7  ;;  %v483_v36 = vrot.slane %v428_v28, 6  ;;  %v485_v37 = vrot.slane %v429_v29, 5  ;;  %v720_v39 = vld [vmem:[%s3225_s7 + $0x49] sm:$0x1] }
  0xed   : > { %v487_v40 = vrot.slane %v430_v30, 4  ;;  %v489_v41 = vrot.slane %v431_v31, 3  ;;  %v491_v42 = vrot.slane %v432_v32, 2  ;;  %v493_v43 = vrot.slane %v433_v33, 1  ;;  %v721_v44 = vld [vmem:[%s3225_s7 + $0x51] sm:$0x1] }
  0xee   : > { %v482_v45 = vsel %vm461_vm10, %v481_v35, %v426_v34  ;;  %v722_v46 = vld [vmem:[%s3225_s7 + $0x59] sm:$0x1]  ;;  %v723_v47 = vld [vmem:[%s3225_s7 + $0x61] sm:$0x1]  ;;  %v724_v48 = vld [vmem:[%s3225_s7 + $0x69] sm:$0x1] }
  0xef   : > { %v484_v49 = vsel %vm464_vm11, %v483_v36, %v482_v45  ;;  %v725_v50 = vld [vmem:[%s3225_s7 + $0x71] sm:$0x1]  ;;  %v726_v51 = vld [vmem:[%s3225_s7 + $0x79] sm:$0x1]  ;;  %v757_v52 = vrot.slane %v720_v39, 7  ;;  %v759_v53 = vrot.slane %v721_v44, 6 }
  0xf0   : > { %v486_v54 = vsel %vm467_vm12, %v485_v37, %v484_v49  ;;  %v761_v55 = vrot.slane %v722_v46, 5  ;;  %v763_v56 = vrot.slane %v723_v47, 4  ;;  %v765_v57 = vrot.slane %v724_v48, 3  ;;  %v986_v58 = vld [vmem:[%s3225_s7 + $0x42] sm:$0x1]  ;;  %s3124_s6 = smov 1  }
  0xf1   : > { %v488_v59 = vsel %vm470_vm13, %v487_v40, %v486_v54  ;;  %v758_v60 = vsel %vm461_vm10, %v757_v52, %v719_v38  ;;  %v767_v61 = vrot.slane %v725_v50, 2  ;;  %v769_v62 = vrot.slane %v726_v51, 1  ;;  %v987_v63 = vld [vmem:[%s3225_s7 + $0x4a] sm:$0x1]  ;;  %v988_v0 = vld [vmem:[%s3225_s7 + $0x52] sm:$0x1] }
  0xf2   : > { %v490_v1 = vsel %vm473_vm14, %v489_v41, %v488_v59  ;;  %v760_v2 = vsel %vm464_vm11, %v759_v53, %v758_v60  ;;  %v989_v3 = vld [vmem:[%s3225_s7 + $0x5a] sm:$0x1]  ;;  %v990_v4 = vld [vmem:[%s3225_s7 + $0x62] sm:$0x1]  ;;  %v991_v5 = vld [vmem:[%s3225_s7 + $0x6a] sm:$0x1] }
  0xf3   : > { %v492_v6 = vsel %vm476_vm15, %v491_v42, %v490_v1  ;;  %v762_v7 = vsel %vm467_vm12, %v761_v55, %v760_v2  ;;  %v992_v8 = vld [vmem:[%s3225_s7 + $0x72] sm:$0x1]  ;;  %v993_v9 = vld [vmem:[%s3225_s7 + $0x7a] sm:$0x1]  ;;  %v1024_v10 = vrot.slane %v987_v63, 7  ;;  %v1026_v11 = vrot.slane %v988_v0, 6 }
  0xf4   : > { %v494_v12 = vsel %vm479_vm0, %v493_v43, %v492_v6  ;;  %v764_v13 = vsel %vm470_vm13, %v763_v56, %v762_v7  ;;  %v1028_v14 = vrot.slane %v989_v3, 5  ;;  %v1030_v15 = vrot.slane %v990_v4, 4  ;;  %v1253_v16 = vld [vmem:[%s3225_s7 + $0x43] sm:$0x1]  ;;  %v1254_v17 = vld [vmem:[%s3225_s7 + $0x4b] sm:$0x1] }
  0xf5   : > { %518 = vmatpush.msra.mxu0 %v494_v12  ;;  %v766_v18 = vsel %vm473_vm14, %v765_v57, %v764_v13  ;;  %v1025_v19 = vsel %vm461_vm10, %v1024_v10, %v986_v58  ;;  %v1032_v20 = vrot.slane %v991_v5, 3  ;;  %v1034_v21 = vrot.slane %v992_v8, 2  ;;  %v1255_v22 = vld [vmem:[%s3225_s7 + $0x53] sm:$0x1]  ;;  %v1256_v23 = vld [vmem:[%s3225_s7 + $0x5b] sm:$0x1] }
  0xf6   : > { %v768_v24 = vsel %vm476_vm15, %v767_v61, %v766_v18  ;;  %v1027_v25 = vsel %vm464_vm11, %v1026_v11, %v1025_v19  ;;  %v1036_v26 = vrot.slane %v993_v9, 1  ;;  %v1257_v27 = vld [vmem:[%s3225_s7 + $0x63] sm:$0x1]  ;;  %v1258_v28 = vld [vmem:[%s3225_s7 + $0x6b] sm:$0x1]  ;;  %v1291_v29 = vrot.slane %v1254_v17, 7 }
  0xf7   : > { %v770_v30 = vsel %vm479_vm0, %v769_v62, %v768_v24  ;;  %v1029_v31 = vsel %vm467_vm12, %v1028_v14, %v1027_v25  ;;  %v1259_v32 = vld [vmem:[%s3225_s7 + $0x73] sm:$0x1]  ;;  %v1260_v33 = vld [vmem:[%s3225_s7 + $0x7b] sm:$0x1]  ;;  %v1293_v34 = vrot.slane %v1255_v22, 6  ;;  %v1295_v35 = vrot.slane %v1256_v23, 5 }
  0xf8   : > { %787 = vmatpush.msra.mxu1 %v770_v30  ;;  %v1031_v36 = vsel %vm470_vm13, %v1030_v15, %v1029_v31  ;;  %v1292_v37 = vsel %vm461_vm10, %v1291_v29, %v1253_v16  ;;  %v1297_v38 = vrot.slane %v1257_v27, 4  ;;  %v1299_v39 = vrot.slane %v1258_v28, 3  ;;  %v418_v40 = vld [vmem:[%s3225_s7] sm:$0x1]  ;;  %v419_v41 = vld [vmem:[%s3225_s7 + $0x8] sm:$0x1] }
  0xf9   : > { %v1033_v42 = vsel %vm473_vm14, %v1032_v20, %v1031_v36  ;;  %v1294_v43 = vsel %vm464_vm11, %v1293_v34, %v1292_v37  ;;  %v1301_v44 = vrot.slane %v1259_v32, 2  ;;  %v1303_v45 = vrot.slane %v1260_v33, 1  ;;  %v420_v46 = vld [vmem:[%s3225_s7 + $0x10] sm:$0x1]  ;;  %v421_v47 = vld [vmem:[%s3225_s7 + $0x18] sm:$0x1] }
  0xfa   : > { %v1035_v48 = vsel %vm476_vm15, %v1034_v21, %v1033_v42  ;;  %v1296_v49 = vsel %vm467_vm12, %v1295_v35, %v1294_v43  ;;  %v422_v50 = vld [vmem:[%s3225_s7 + $0x20] sm:$0x1]  ;;  %v423_v51 = vld [vmem:[%s3225_s7 + $0x28] sm:$0x1]  ;;  %v424_v52 = vld [vmem:[%s3225_s7 + $0x30] sm:$0x1] }
  0xfb   : > { %v1037_v53 = vsel %vm479_vm0, %v1036_v26, %v1035_v48  ;;  %v1298_v54 = vsel %vm470_vm13, %v1297_v38, %v1296_v49  ;;  %v425_v55 = vld [vmem:[%s3225_s7 + $0x38] sm:$0x1]  ;;  %v460_v56 = vrot.slane %v419_v41, 7  ;;  %v463_v57 = vrot.slane %v420_v46, 6  ;;  %v711_v62 = vld [vmem:[%s3225_s7 + $0x1] sm:$0x1] }
  0xfc   : > { %1054 = vmatpush.msra.mxu2 %v1037_v53  ;;  %v1300_v58 = vsel %vm473_vm14, %v1299_v39, %v1298_v54  ;;  %v466_v59 = vrot.slane %v421_v47, 5  ;;  %v469_v60 = vrot.slane %v422_v50, 4  ;;  %v472_v61 = vrot.slane %v423_v51, 3  ;;  %v712_v63 = vld [vmem:[%s3225_s7 + $0x9] sm:$0x1]  ;;  %v3425_v21 = vld [vmem:[%s4426_s1] sm:$0xff] }
  0xfd   : > { %v1302_v0 = vsel %vm476_vm15, %v1301_v44, %v1300_v58  ;;  %v462_v1 = vsel %vm461_vm10, %v460_v56, %v418_v40  ;;  %v475_v2 = vrot.slane %v424_v52, 2  ;;  %v478_v3 = vrot.slane %v425_v55, 1  ;;  %v713_v4 = vld [vmem:[%s3225_s7 + $0x11] sm:$0x1]  ;;  %v714_v5 = vld [vmem:[%s3225_s7 + $0x19] sm:$0x1] }
  0xfe   : > { %v1304_v6 = vsel %vm479_vm0, %v1303_v45, %v1302_v0  ;;  %v465_v7 = vsel %vm464_vm11, %v463_v57, %v462_v1  ;;  %v715_v8 = vld [vmem:[%s3225_s7 + $0x21] sm:$0x1]  ;;  %v716_v9 = vld [vmem:[%s3225_s7 + $0x29] sm:$0x1]  ;;  %v717_v10 = vld [vmem:[%s3225_s7 + $0x31] sm:$0x1] }
  0xff   : > { %1321 = vmatpush.msra.mxu3 %v1304_v6  ;;  %v468_v11 = vsel %vm467_vm12, %v466_v59, %v465_v7  ;;  %v718_v12 = vld [vmem:[%s3225_s7 + $0x39] sm:$0x1]  ;;  %v743_v13 = vrot.slane %v712_v63, 7  ;;  %v745_v14 = vrot.slane %v713_v4, 6  ;;  %v747_v15 = vrot.slane %v714_v5, 5  ;;  %v416_v59 = vld [vmem:[%s4427_s2] sm:$0xff] }
 0x100   : > { %v471_v16 = vsel %vm470_vm13, %v469_v60, %v468_v11  ;;  %v749_v17 = vrot.slane %v715_v8, 4  ;;  %v751_v18 = vrot.slane %v716_v9, 3  ;;  %v753_v19 = vrot.slane %v717_v10, 2  ;;  %v978_v20 = vld [vmem:[%s3225_s7 + $0x2] sm:$0x1]  ;;  %v3464_v0 = vld [vmem:[%s4426_s1 + $0x8] sm:$0xff] }
 0x101   : > { %v474_v22 = vsel %vm473_vm14, %v472_v61, %v471_v16  ;;  %v744_v23 = vsel %vm461_vm10, %v743_v13, %v711_v62  ;;  %v755_v24 = vrot.slane %v718_v12, 1  ;;  %v979_v25 = vld [vmem:[%s3225_s7 + $0xa] sm:$0x1]  ;;  %v980_v26 = vld [vmem:[%s3225_s7 + $0x12] sm:$0x1]  ;;  %vm497_vm1 = vcmask 130048  }
 0x102   : > { %v477_v27 = vsel %vm476_vm15, %v475_v2, %v474_v22  ;;  %v746_v28 = vsel %vm464_vm11, %v745_v14, %v744_v23  ;;  %v981_v29 = vld [vmem:[%s3225_s7 + $0x1a] sm:$0x1]  ;;  %v982_v30 = vld [vmem:[%s3225_s7 + $0x22] sm:$0x1]  ;;  %v983_v31 = vld [vmem:[%s3225_s7 + $0x2a] sm:$0x1] }
 0x103   : > { %v480_v32 = vsel %vm479_vm0, %v478_v3, %v477_v27  ;;  %v748_v33 = vsel %vm467_vm12, %v747_v15, %v746_v28  ;;  %v984_v34 = vld [vmem:[%s3225_s7 + $0x32] sm:$0x1]  ;;  %v985_v35 = vld [vmem:[%s3225_s7 + $0x3a] sm:$0x1]  ;;  %v1010_v36 = vrot.slane %v979_v25, 7  ;;  %v1012_v37 = vrot.slane %v980_v26, 6 }
 0x104   : > { %519 = vmatpush.msra.mxu0 %v480_v32  ;;  %v750_v38 = vsel %vm470_vm13, %v749_v17, %v748_v33  ;;  %v1014_v39 = vrot.slane %v981_v29, 5  ;;  %v1016_v40 = vrot.slane %v982_v30, 4  ;;  %v1018_v41 = vrot.slane %v983_v31, 3  ;;  %v1245_v42 = vld [vmem:[%s3225_s7 + $0x3] sm:$0x1] }
 0x105   : > { %v752_v43 = vsel %vm473_vm14, %v751_v18, %v750_v38  ;;  %v1011_v44 = vsel %vm461_vm10, %v1010_v36, %v978_v20  ;;  %v1020_v45 = vrot.slane %v984_v34, 2  ;;  %v1022_v46 = vrot.slane %v985_v35, 1  ;;  %v1246_v47 = vld [vmem:[%s3225_s7 + $0xb] sm:$0x1]  ;;  %v1247_v48 = vld [vmem:[%s3225_s7 + $0x13] sm:$0x1]  ;;  %2697 = vmatmul.msk.f32.vlgmr.msra.gmra.mxu0 %vm497_vm1, %v3425_v21 }
 0x106   : > { %v754_v49 = vsel %vm476_vm15, %v753_v19, %v752_v43  ;;  %v1013_v50 = vsel %vm464_vm11, %v1012_v37, %v1011_v44  ;;  %v1248_v51 = vld [vmem:[%s3225_s7 + $0x1b] sm:$0x1]  ;;  %v1249_v52 = vld [vmem:[%s3225_s7 + $0x23] sm:$0x1]  ;;  %v1250_v53 = vld [vmem:[%s3225_s7 + $0x2b] sm:$0x1] }
 0x107   : > { %v756_v54 = vsel %vm479_vm0, %v755_v24, %v754_v49  ;;  %v1015_v55 = vsel %vm467_vm12, %v1014_v39, %v1013_v50  ;;  %v1251_v56 = vld [vmem:[%s3225_s7 + $0x33] sm:$0x1]  ;;  %v1277_v57 = vrot.slane %v1246_v47, 7  ;;  %v1279_v58 = vrot.slane %v1247_v48, 6  ;;  %v1252_v61 = vld [vmem:[%s3225_s7 + $0x3b] sm:$0x1] }
 0x108   : > { %788 = vmatpush.msra.mxu1 %v756_v54  ;;  %v1017_v60 = vsel %vm470_vm13, %v1016_v40, %v1015_v55  ;;  %v1281_v62 = vrot.slane %v1248_v51, 5  ;;  %v1283_v63 = vrot.slane %v1249_v52, 4  ;;  %v1520_v1 = vld [vmem:[%s3225_s7 + $0x44] sm:$0x1]  ;;  %v1285_v4 = vrot.slane %v1250_v53, 3  ;;  %v417_v38 = vld [vmem:[%s4427_s2 + $0x8] sm:$0xff] }
 0x109   : > { %v1019_v2 = vsel %vm473_vm14, %v1018_v41, %v1017_v60  ;;  %v1278_v3 = vsel %vm461_vm10, %v1277_v57, %v1245_v42  ;;  %v1287_v5 = vrot.slane %v1251_v56, 2  ;;  %2718 = vmatmul.msk.f32.vlgmr.msra.gmra.mxu1 %vm497_vm1, %v3425_v21  ;;  %v1521_v6 = vld [vmem:[%s3225_s7 + $0x4c] sm:$0x1]  ;;  %v1522_v7 = vld [vmem:[%s3225_s7 + $0x54] sm:$0x1]  ;;  %v1289_v15 = vrot.slane %v1252_v61, 1 }
 0x10a   : > { %v1021_v8 = vsel %vm476_vm15, %v1020_v45, %v1019_v2  ;;  %v1280_v9 = vsel %vm464_vm11, %v1279_v58, %v1278_v3  ;;  %v1523_v10 = vld [vmem:[%s3225_s7 + $0x5c] sm:$0x1]  ;;  %v1524_v11 = vld [vmem:[%s3225_s7 + $0x64] sm:$0x1]  ;;  %v1558_v12 = vrot.slane %v1521_v6, 7  ;;  %v3123_v16 = vmov 0  }
 0x10b   : > { %v1023_v13 = vsel %vm479_vm0, %v1022_v46, %v1021_v8  ;;  %v1282_v14 = vsel %vm467_vm12, %v1281_v62, %v1280_v9  ;;  %2956 = vset.pattern.permute.xlu0 %v3123_v16  ;;  %v1525_v17 = vld [vmem:[%s3225_s7 + $0x6c] sm:$0x1]  ;;  %v1526_v18 = vld [vmem:[%s3225_s7 + $0x74] sm:$0x1]  ;;  %v1527_v20 = vld [vmem:[%s3225_s7 + $0x7c] sm:$0x1] }
 0x10c   : > { %1055 = vmatpush.msra.mxu2 %v1023_v13  ;;  %v1284_v19 = vsel %vm470_vm13, %v1283_v63, %v1282_v14  ;;  %436 = vperm.xlu0 %2956, %v416_v59   ;;  %v1559_v22 = vsel %vm461_vm10, %v1558_v12, %v1520_v1  ;;  %v1560_v23 = vrot.slane %v1522_v7, 6  ;;  %v1562_v24 = vrot.slane %v1523_v10, 5  ;;  %v1788_v25 = vld [vmem:[%s3225_s7 + $0x4d] sm:$0x1]  ;;  %v1787_v29 = vld [vmem:[%s3225_s7 + $0x45] sm:$0x1] }
 0x10d   : > { %v1286_v26 = vsel %vm473_vm14, %v1285_v4, %v1284_v19  ;;  %2739 = vmatmul.msk.f32.vlgmr.msra.gmra.mxu2 %vm497_vm1, %v3425_v21  ;;  %2698 = vmatmul.msk.f32.gmra.mxu0 %vm497_vm1, %v3464_v0  ;;  %v1564_v27 = vrot.slane %v1524_v11, 4  ;;  %v1566_v28 = vrot.slane %v1525_v17, 3  ;;  %v1789_v30 = vld [vmem:[%s3225_s7 + $0x55] sm:$0x1]  ;;  %v1568_v33 = vrot.slane %v1526_v18, 2 }
 0x10e   : > { %v1288_v31 = vsel %vm476_vm15, %v1287_v5, %v1286_v26  ;;  %v1561_v32 = vsel %vm464_vm11, %v1560_v23, %v1559_v22  ;;  %v1790_v34 = vld [vmem:[%s3225_s7 + $0x5d] sm:$0x1]  ;;  %v1791_v35 = vld [vmem:[%s3225_s7 + $0x65] sm:$0x1]  ;;  %v1825_v36 = vrot.slane %v1788_v25, 7  ;;  %v1570_v40 = vrot.slane %v1527_v20, 1 }
 0x10f   : > { %v1290_v37 = vsel %vm479_vm0, %v1289_v15, %v1288_v31  ;;  %v1563_v39 = vsel %vm467_vm12, %v1562_v24, %v1561_v32  ;;  %v1792_v41 = vld [vmem:[%s3225_s7 + $0x6d] sm:$0x1]  ;;  %v1793_v42 = vld [vmem:[%s3225_s7 + $0x75] sm:$0x1]  ;;  %v1794_v44 = vld [vmem:[%s3225_s7 + $0x7d] sm:$0x1] }
 0x110   : > { %1322 = vmatpush.msra.mxu3 %v1290_v37  ;;  %v1565_v43 = vsel %vm470_vm13, %v1564_v27, %v1563_v39  ;;  %v1826_v45 = vsel %vm461_vm10, %v1825_v36, %v1787_v29  ;;  %v1827_v46 = vrot.slane %v1789_v30, 6  ;;  %v1829_v47 = vrot.slane %v1790_v34, 5  ;;  %v2055_v48 = vld [vmem:[%s3225_s7 + $0x4e] sm:$0x1]  ;;  %v2054_v52 = vld [vmem:[%s3225_s7 + $0x46] sm:$0x1] }
 0x111   : > { %2760 = vmatmul.msk.f32.vlgmr.msra.gmra.mxu3 %vm497_vm1, %v3425_v21  ;;  %2719 = vmatmul.msk.f32.gmra.mxu1 %vm497_vm1, %v3464_v0  ;;  %v1567_v49 = vsel %vm473_vm14, %v1566_v28, %v1565_v43  ;;  %v1831_v50 = vrot.slane %v1791_v35, 4  ;;  %v1833_v51 = vrot.slane %v1792_v41, 3  ;;  %v2056_v53 = vld [vmem:[%s3225_s7 + $0x56] sm:$0x1]  ;;  %v1835_v56 = vrot.slane %v1793_v42, 2 }
 0x112   : > { %v1569_v54 = vsel %vm476_vm15, %v1568_v33, %v1567_v49  ;;  %v1828_v55 = vsel %vm464_vm11, %v1827_v46, %v1826_v45  ;;  %v2057_v57 = vld [vmem:[%s3225_s7 + $0x5e] sm:$0x1]  ;;  %v2058_v58 = vld [vmem:[%s3225_s7 + $0x66] sm:$0x1]  ;;  %v2092_v59 = vrot.slane %v2055_v48, 7  ;;  %v1837_v62 = vrot.slane %v1794_v44, 1 }
 0x113   : > { %v1571_v60 = vsel %vm479_vm0, %v1570_v40, %v1569_v54  ;;  %v1830_v61 = vsel %vm467_vm12, %v1829_v47, %v1828_v55  ;;  %v2059_v63 = vld [vmem:[%s3225_s7 + $0x6e] sm:$0x1]  ;;  %v2060_v1 = vld [vmem:[%s3225_s7 + $0x76] sm:$0x1]  ;;  %v2061_v3 = vld [vmem:[%s3225_s7 + $0x7e] sm:$0x1] }
 0x114   : > { %441 = vperm.xlu0 %2956, %v417_v38   ;;  %1588 = vmatpush.msrb.mxu0 %v1571_v60  ;;  %v1832_v2 = vsel %vm470_vm13, %v1831_v50, %v1830_v61  ;;  %v2093_v4 = vsel %vm461_vm10, %v2092_v59, %v2054_v52  ;;  %v2094_v5 = vrot.slane %v2056_v53, 6  ;;  %v2096_v6 = vrot.slane %v2057_v57, 5  ;;  %v2322_v7 = vld [vmem:[%s3225_s7 + $0x4f] sm:$0x1]  ;;  %v2321_v11 = vld [vmem:[%s3225_s7 + $0x47] sm:$0x1] }
 0x115   : > { %2740 = vmatmul.msk.f32.gmra.mxu2 %vm497_vm1, %v3464_v0  ;;  %v1834_v8 = vsel %vm473_vm14, %v1833_v51, %v1832_v2  ;;  %v2098_v9 = vrot.slane %v2058_v58, 4  ;;  %v2100_v10 = vrot.slane %v2059_v63, 3  ;;  %v2323_v12 = vld [vmem:[%s3225_s7 + $0x57] sm:$0x1]  ;;  %v2102_v15 = vrot.slane %v2060_v1, 2 }
 0x116   : > { %v1836_v13 = vsel %vm476_vm15, %v1835_v56, %v1834_v8  ;;  %v2095_v14 = vsel %vm464_vm11, %v2094_v5, %v2093_v4  ;;  %v2324_v16 = vld [vmem:[%s3225_s7 + $0x5f] sm:$0x1]  ;;  %v2325_v17 = vld [vmem:[%s3225_s7 + $0x67] sm:$0x1]  ;;  %v2359_v18 = vrot.slane %v2322_v7, 7  ;;  %v2104_v22 = vrot.slane %v2061_v3, 1 }
 0x117   : > { %v1838_v19 = vsel %vm479_vm0, %v1837_v62, %v1836_v13  ;;  %v2097_v20 = vsel %vm467_vm12, %v2096_v6, %v2095_v14  ;;  %v2326_v23 = vld [vmem:[%s3225_s7 + $0x6f] sm:$0x1]  ;;  %v2327_v24 = vld [vmem:[%s3225_s7 + $0x77] sm:$0x1]  ;;  %v2328_v26 = vld [vmem:[%s3225_s7 + $0x7f] sm:$0x1] }
 0x118   : > { %1855 = vmatpush.msrb.mxu1 %v1838_v19  ;;  %v2099_v25 = vsel %vm470_vm13, %v2098_v9, %v2097_v20  ;;  %v2360_v27 = vsel %vm461_vm10, %v2359_v18, %v2321_v11  ;;  %v2361_v28 = vrot.slane %v2323_v12, 6  ;;  %v2363_v29 = vrot.slane %v2324_v16, 5  ;;  %v1513_v30 = vld [vmem:[%s3225_s7 + $0xc] sm:$0x1]  ;;  %v1512_v34 = vld [vmem:[%s3225_s7 + $0x4] sm:$0x1] }
 0x119   : > { %2761 = vmatmul.msk.f32.gmra.mxu3 %vm497_vm1, %v3464_v0  ;;  %v2101_v31 = vsel %vm473_vm14, %v2100_v10, %v2099_v25  ;;  %v2365_v32 = vrot.slane %v2325_v17, 4  ;;  %v2367_v33 = vrot.slane %v2326_v23, 3  ;;  %v1514_v35 = vld [vmem:[%s3225_s7 + $0x14] sm:$0x1]  ;;  %v2369_v38 = vrot.slane %v2327_v24, 2 }
 0x11a   : > { %v2103_v36 = vsel %vm476_vm15, %v2102_v15, %v2101_v31  ;;  %v2362_v37 = vsel %vm464_vm11, %v2361_v28, %v2360_v27  ;;  %v1515_v39 = vld [vmem:[%s3225_s7 + $0x1c] sm:$0x1]  ;;  %v1516_v40 = vld [vmem:[%s3225_s7 + $0x24] sm:$0x1]  ;;  %v1544_v41 = vrot.slane %v1513_v30, 7  ;;  %v2371_v44 = vrot.slane %v2328_v26, 1 }
 0x11b   : > { %v2105_v42 = vsel %vm479_vm0, %v2104_v22, %v2103_v36  ;;  %v2364_v43 = vsel %vm467_vm12, %v2363_v29, %v2362_v37  ;;  %v1517_v45 = vld [vmem:[%s3225_s7 + $0x2c] sm:$0x1]  ;;  %v1518_v46 = vld [vmem:[%s3225_s7 + $0x34] sm:$0x1]  ;;  %v1519_v48 = vld [vmem:[%s3225_s7 + $0x3c] sm:$0x1] }
 0x11c   : > { %2122 = vmatpush.msrb.mxu2 %v2105_v42  ;;  %v2366_v47 = vsel %vm470_vm13, %v2365_v32, %v2364_v43  ;;  %v1545_v49 = vsel %vm461_vm10, %v1544_v41, %v1512_v34  ;;  %v1546_v50 = vrot.slane %v1514_v35, 6  ;;  %v1548_v51 = vrot.slane %v1515_v39, 5  ;;  %v1780_v52 = vld [vmem:[%s3225_s7 + $0xd] sm:$0x1]  ;;  %v1779_v56 = vld [vmem:[%s3225_s7 + $0x5] sm:$0x1] }
 0x11d   : > { %v2368_v53 = vsel %vm473_vm14, %v2367_v33, %v2366_v47  ;;  %v1550_v54 = vrot.slane %v1516_v40, 4  ;;  %v1552_v55 = vrot.slane %v1517_v45, 3  ;;  %v1781_v57 = vld [vmem:[%s3225_s7 + $0x15] sm:$0x1]  ;;  %v1554_v60 = vrot.slane %v1518_v46, 2 }
 0x11e   : > { %v2370_v58 = vsel %vm476_vm15, %v2369_v38, %v2368_v53  ;;  %v1547_v59 = vsel %vm464_vm11, %v1546_v50, %v1545_v49  ;;  %v1782_v61 = vld [vmem:[%s3225_s7 + $0x1d] sm:$0x1]  ;;  %v1783_v62 = vld [vmem:[%s3225_s7 + $0x25] sm:$0x1]  ;;  %v1811_v63 = vrot.slane %v1780_v52, 7  ;;  %v1556_v3 = vrot.slane %v1519_v48, 1 }
 0x11f   : > { %v2372_v1 = vsel %vm479_vm0, %v2371_v44, %v2370_v58  ;;  %v1549_v2 = vsel %vm467_vm12, %v1548_v51, %v1547_v59  ;;  %v1784_v4 = vld [vmem:[%s3225_s7 + $0x2d] sm:$0x1]  ;;  %v1785_v5 = vld [vmem:[%s3225_s7 + $0x35] sm:$0x1]  ;;  %v1786_v7 = vld [vmem:[%s3225_s7 + $0x3d] sm:$0x1] }
 0x120   : > { %2389 = vmatpush.msrb.mxu3 %v2372_v1  ;;  %v1551_v6 = vsel %vm470_vm13, %v1550_v54, %v1549_v2  ;;  %v1812_v8 = vsel %vm461_vm10, %v1811_v63, %v1779_v56  ;;  %v1813_v9 = vrot.slane %v1781_v57, 6  ;;  %v1815_v10 = vrot.slane %v1782_v61, 5  ;;  %v2047_v11 = vld [vmem:[%s3225_s7 + $0xe] sm:$0x1]  ;;  %v2046_v15 = vld [vmem:[%s3225_s7 + $0x6] sm:$0x1] }
 0x121   : > { %v1553_v12 = vsel %vm473_vm14, %v1552_v55, %v1551_v6  ;;  %v1817_v13 = vrot.slane %v1783_v62, 4  ;;  %v1819_v14 = vrot.slane %v1784_v4, 3  ;;  %v2048_v16 = vld [vmem:[%s3225_s7 + $0x16] sm:$0x1]  ;;  %v1821_v19 = vrot.slane %v1785_v5, 2 }
 0x122   : > { %v1555_v17 = vsel %vm476_vm15, %v1554_v60, %v1553_v12  ;;  %v1814_v18 = vsel %vm464_vm11, %v1813_v9, %v1812_v8  ;;  %v2049_v20 = vld [vmem:[%s3225_s7 + $0x1e] sm:$0x1]  ;;  %v2050_v22 = vld [vmem:[%s3225_s7 + $0x26] sm:$0x1]  ;;  %v2078_v23 = vrot.slane %v2047_v11, 7  ;;  %v1823_v26 = vrot.slane %v1786_v7, 1 }
 0x123   : > { %v1557_v24 = vsel %vm479_vm0, %v1556_v3, %v1555_v17  ;;  %v1816_v25 = vsel %vm467_vm12, %v1815_v10, %v1814_v18  ;;  %v2051_v27 = vld [vmem:[%s3225_s7 + $0x2e] sm:$0x1]  ;;  %v2052_v28 = vld [vmem:[%s3225_s7 + $0x36] sm:$0x1]  ;;  %v2053_v30 = vld [vmem:[%s3225_s7 + $0x3e] sm:$0x1] }
 0x124   : > { %1589 = vmatpush.msrb.mxu0 %v1557_v24  ;;  %v1818_v29 = vsel %vm470_vm13, %v1817_v13, %v1816_v25  ;;  %v2079_v31 = vsel %vm461_vm10, %v2078_v23, %v2046_v15  ;;  %v2080_v32 = vrot.slane %v2048_v16, 6  ;;  %v2082_v33 = vrot.slane %v2049_v20, 5  ;;  %v2314_v34 = vld [vmem:[%s3225_s7 + $0xf] sm:$0x1]  ;;  %v2313_v38 = vld [vmem:[%s3225_s7 + $0x7] sm:$0x1] }
 0x125   : > { %v1820_v35 = vsel %vm473_vm14, %v1819_v14, %v1818_v29  ;;  %v2084_v36 = vrot.slane %v2050_v22, 4  ;;  %v2086_v37 = vrot.slane %v2051_v27, 3  ;;  %v2315_v39 = vld [vmem:[%s3225_s7 + $0x17] sm:$0x1]  ;;  %2781 = vmatmul.msk.f32.vlgmr.msrb.gmra.mxu0 %vm497_vm1, %v3425_v21  ;;  %v2088_v42 = vrot.slane %v2052_v28, 2 }
 0x126   : > { %v1822_v40 = vsel %vm476_vm15, %v1821_v19, %v1820_v35  ;;  %v2081_v41 = vsel %vm464_vm11, %v2080_v32, %v2079_v31  ;;  %v2316_v43 = vld [vmem:[%s3225_s7 + $0x1f] sm:$0x1]  ;;  %v2317_v44 = vld [vmem:[%s3225_s7 + $0x27] sm:$0x1]  ;;  %v2345_v45 = vrot.slane %v2314_v34, 7  ;;  %v2090_v48 = vrot.slane %v2053_v30, 1 }
 0x127   : > { %v1824_v46 = vsel %vm479_vm0, %v1823_v26, %v1822_v40  ;;  %v2083_v47 = vsel %vm467_vm12, %v2082_v33, %v2081_v41  ;;  %v2318_v49 = vld [vmem:[%s3225_s7 + $0x2f] sm:$0x1]  ;;  %v2319_v50 = vld [vmem:[%s3225_s7 + $0x37] sm:$0x1]  ;;  %v2320_v52 = vld [vmem:[%s3225_s7 + $0x3f] sm:$0x1] }
 0x128   : > { %1856 = vmatpush.msrb.mxu1 %v1824_v46  ;;  %v2085_v51 = vsel %vm470_vm13, %v2084_v36, %v2083_v47  ;;  %v2346_v53 = vsel %vm461_vm10, %v2345_v45, %v2313_v38  ;;  %v2347_v54 = vrot.slane %v2315_v39, 6  ;;  %v2349_v55 = vrot.slane %v2316_v43, 5  ;;  %s2701_s7 = sshll.u32 %s3101_s15, 3 }
 0x129   : > { %v2087_v56 = vsel %vm473_vm14, %v2086_v37, %v2085_v51  ;;  %v2351_v57 = vrot.slane %v2317_v44, 4  ;;  %v2353_v58 = vrot.slane %v2318_v49, 3  ;;  %2802 = vmatmul.msk.f32.vlgmr.msrb.gmra.mxu1 %vm497_vm1, %v3425_v21  ;;  %v2355_v61 = vrot.slane %v2319_v50, 2  ;;  %s3775_s25 = scalar_lea.vmem %s3236_s9, %s2701_s7 }
 0x12a   : > { %v2089_v59 = vsel %vm476_vm15, %v2088_v42, %v2087_v56  ;;  %v2348_v60 = vsel %vm464_vm11, %v2347_v54, %v2346_v53  ;;  %v2357_v1 = vrot.slane %v2320_v52, 1 }
 0x12b   : > { %v2091_v62 = vsel %vm479_vm0, %v2090_v48, %v2089_v59  ;;  %v2350_v63 = vsel %vm467_vm12, %v2349_v55, %v2348_v60 }
 0x12c   : > { %2123 = vmatpush.msrb.mxu2 %v2091_v62  ;;  %v2352_v2 = vsel %vm470_vm13, %v2351_v57, %v2350_v63 }
 0x12d   : > { %v2354_v3 = vsel %vm473_vm14, %v2353_v58, %v2352_v2  ;;  %2823 = vmatmul.msk.f32.vlgmr.msrb.gmra.mxu2 %vm497_vm1, %v3425_v21  ;;  %2782 = vmatmul.msk.f32.gmra.mxu0 %vm497_vm1, %v3464_v0 }
 0x12e   : > { %v2356_v4 = vsel %vm476_vm15, %v2355_v61, %v2354_v3 }
 0x12f   : > { %v2358_v5 = vsel %vm479_vm0, %v2357_v1, %v2356_v4 }
 0x130   : > { %2390 = vmatpush.msrb.mxu3 %v2358_v5 }
 0x131   : > { %2844 = vmatmul.msk.f32.vlgmr.msrb.gmra.mxu3 %vm497_vm1, %v3425_v21  ;;  %2803 = vmatmul.msk.f32.gmra.mxu1 %vm497_vm1, %v3464_v0 }
 0x135   : > { %2824 = vmatmul.msk.f32.gmra.mxu2 %vm497_vm1, %v3464_v0 }
 0x139   : > { %2845 = vmatmul.msk.f32.gmra.mxu3 %vm497_vm1, %v3464_v0 }
 0x17e   : > { %v3629_v6 = vpop.permute.xlu0 %436 }
 0x182   : > { %v521_v7 = vpop.f32.mrf.mxu0 }
 0x183   : > { %v522_v8 = vadd.f32 %v521_v7, %v3629_v6 }
 0x185   : > { %v2699_v9 = vmul.f32 -1.442695, %v522_v8 }
 0x186   : > { %v790_v10 = vpop.f32.mrf.mxu1  ;;  %v3640_v49 = vpop.permute.xlu0 %441 }
 0x187   : > { %2957 = vpow2.f32 %v2699_v9  ;;  %v791_v11 = vadd.f32 %v790_v10, %v3629_v6 }
 0x189   : > { %v2720_v21 = vmul.f32 -1.442695, %v791_v11 }
 0x18a   : > { %v524_v52 = vpop.f32.mrf.mxu0 }
 0x18b   : > { %2959 = vpow2.f32 %v2720_v21  ;;  %v525_v54 = vadd.f32 %v524_v52, %v3640_v49 }
 0x18d   : > { %v2958_v12 = vpop.eup %2957  ;;  %v2700_v59 = vmul.f32 -1.442695, %v525_v54 }
 0x18e   : > { %v533_v13 = vadd.f32 1.0, %v2958_v12  ;;  %v793_v47 = vpop.f32.mrf.mxu1 }
 0x18f   : > { %v794_v51 = vadd.f32 %v793_v47, %v3640_v49 }
 0x190   : > { %2961 = vrcp.f32 %v533_v13  ;;  %v546_v30 = vand.u32 2147483648, %v533_v13  ;;  %vm540_vm7 = vweird.f32 %v533_v13  ;;  %v544_v32 = vand.u32 2147483647, %v533_v13  ;;  %v1057_v39 = vpop.f32.mrf.mxu2 }
 0x191   : > { %v2960_v14 = vpop.eup %2959  ;;  %v1058_v41 = vadd.f32 %v1057_v39, %v3629_v6  ;;  %v2721_v55 = vmul.f32 -1.442695, %v794_v51 }
 0x192   : > { %v802_v15 = vadd.f32 1.0, %v2960_v14  ;;  %v547_v35 = vor.u32 1.1754944e-38, %v546_v30  ;;  %vm545_vm9 = vcmp.eq.f32.partialorder %v544_v32, 8.507059e+37 }
 0x193   : > { %v2741_v42 = vmul.f32 -1.442695, %v1058_v41 }
 0x194   : > { %2963 = vrcp.f32 %v802_v15  ;;  %v815_v24 = vand.u32 2147483648, %v802_v15  ;;  %vm809_vm3 = vweird.f32 %v802_v15  ;;  %v813_v26 = vand.u32 2147483647, %v802_v15  ;;  %v1324_v43 = vpop.f32.mrf.mxu3 }
 0x195   : > { %2965 = vpow2.f32 %v2741_v42  ;;  %v1325_v44 = vadd.f32 %v1324_v43, %v3629_v6 }
 0x196   : > { %v2962_v16 = vpop.eup %2961  ;;  %v816_v28 = vor.u32 1.1754944e-38, %v815_v24  ;;  %vm814_vm6 = vcmp.eq.f32.partialorder %v813_v26, 8.507059e+37 }
 0x197   : > { %v536_v18 = vmul.f32 %v2962_v16, %v533_v13  ;;  %vm541_vm5 = vweird.f32 %v2962_v16  ;;  %v2762_v45 = vmul.f32 -1.442695, %v1325_v44 }
 0x198   : > { %vm542_vm8 = vmor %vm540_vm7, %vm541_vm5 }
 0x199   : > { %v537_v22 = vsub.f32 1.0, %v536_v18  ;;  %2967 = vpow2.f32 %v2762_v45 }
 0x19a   : > { %v2964_v0 = vpop.eup %2963 }
 0x19b   : > { %v805_v17 = vmul.f32 %v2964_v0, %v802_v15  ;;  %vm810_vm2 = vweird.f32 %v2964_v0  ;;  %v538_v25 = vmul.f32 %v2962_v16, %v537_v22  ;;  %v2966_v46 = vpop.eup %2965 }
 0x19c   : > { %vm811_vm4 = vmor %vm809_vm3, %vm810_vm2  ;;  %v3642_v50 = vadd.f32 1.0, %v2966_v46 }
 0x19d   : > { %v806_v19 = vsub.f32 1.0, %v805_v17  ;;  %v539_v29 = vadd.f32 %v2962_v16, %v538_v25 }
 0x19e   : > { %2969 = vrcp.f32 %v3642_v50  ;;  %v1082_v32 = vand.u32 2147483648, %v3642_v50  ;;  %vm1076_vm11 = vweird.f32 %v3642_v50 }
 0x19f   : > { %v807_v20 = vmul.f32 %v2964_v0, %v806_v19  ;;  %v543_v33 = vsel %vm542_vm8, %v2962_v16, %v539_v29  ;;  %v2968_v58 = vpop.eup %2967  ;;  %2971 = vpow2.f32 %v2721_v55 }
 0x1a0   : > { %v548_v37 = vsel %vm545_vm9, %v547_v35, %v543_v33  ;;  %v3648_v60 = vadd.f32 1.0, %v2968_v58  ;;  %2973 = vpow2.f32 %v2700_v59  ;;  %v1080_v35 = vand.u32 2147483647, %v3642_v50 }
 0x1a1   : > { %v808_v23 = vadd.f32 %v2964_v0, %v807_v20  ;;  %v597_v38 = vadd.f32 1.01, %v548_v37  ;;  %v568_v48 = vrot.slane %v548_v37, 2  ;;  %v570_v57 = vrot.slane %v548_v37, 4 }
 0x1a2   : > { %v567_v62 = vrot.slane %v548_v37, 1  ;;  %v569_v3 = vrot.slane %v548_v37, 3  ;;  %v573_v4 = vrot.slane %v548_v37, 7  ;;  %2975 = vrcp.f32 %v3648_v60 }
 0x1a3   : > { %v812_v27 = vsel %vm811_vm4, %v2964_v0, %v808_v23  ;;  %v629_v40 = vperm.slane %v597_v38, 0  ;;  %v599_v53 = vadd.f32 1.01, %v568_v48  ;;  %v601_v61 = vadd.f32 1.01, %v570_v57 }
 0x1a4   : > { %v3633_v31 = vsel %vm814_vm6, %v816_v28, %v812_v27  ;;  %v3650_v63 = vpop.eup %2969  ;;  %v598_v2 = vadd.f32 1.01, %v567_v62  ;;  %v571_v8 = vrot.slane %v548_v37, 5  ;;  %v600_v10 = vadd.f32 1.01, %v569_v3 }
 0x1a5   : > { %v865_v34 = vadd.f32 1.01, %v3633_v31  ;;  %645 = vrot.lane.b32.xlu1 %v629_v40, %s3124_s6  ;;  %v631_v56 = vperm.slane %v599_v53, 0  ;;  %v633_v1 = vperm.slane %v601_v61, 0  ;;  %v1072_v5 = vmul.f32 %v3650_v63, %v3642_v50  ;;  %v2972_v9 = vpop.eup %2971 }
 0x1a6   : > { %v630_v7 = vperm.slane %v598_v2, 0  ;;  %v604_v11 = vadd.f32 1.01, %v573_v4  ;;  %v632_v21 = vperm.slane %v600_v10, 0  ;;  %v572_v12 = vrot.slane %v548_v37, 6  ;;  %v2974_v16 = vpop.eup %2973 }
 0x1a7   : > { %v897_v36 = vperm.slane %v865_v34, 0  ;;  %649 = vrot.lane.b32.xlu2 %v631_v56, %s3124_s6  ;;  %v1073_v13 = vsub.f32 1.0, %v1072_v5  ;;  %v3657_v14 = vadd.f32 1.0, %v2972_v9  ;;  %v602_v15 = vadd.f32 1.01, %v571_v8 }
 0x1a8   : > { %v3660_v0 = vpop.eup %2975  ;;  %v636_v17 = vperm.slane %v604_v11, 0  ;;  %v838_v18 = vrot.slane %v3633_v31, 3  ;;  %v603_v19 = vadd.f32 1.01, %v572_v12  ;;  %v836_v23 = vrot.slane %v3633_v31, 1 }
 0x1a9   : > { %913 = vrot.lane.b32.xlu0 %v897_v36, %s3124_s6  ;;  %v1074_v20 = vmul.f32 %v3650_v63, %v1073_v13  ;;  %2977 = vrcp.f32 %v3657_v14  ;;  %v634_v22 = vperm.slane %v602_v15, 0  ;;  %v1339_v24 = vmul.f32 %v3660_v0, %v3648_v60 }
 0x1aa   : > { %v3669_v25 = vadd.f32 1.0, %v2974_v16  ;;  %v868_v26 = vadd.f32 1.01, %v838_v18  ;;  %v635_v27 = vperm.slane %v603_v19, 0  ;;  %v837_v28 = vrot.slane %v3633_v31, 2 }
 0x1ab   : > { %v1075_v29 = vadd.f32 %v3650_v63, %v1074_v20  ;;  %vm1077_vm10 = vweird.f32 %v3650_v63  ;;  %v866_v30 = vadd.f32 1.01, %v836_v23  ;;  %v1340_v33 = vsub.f32 1.0, %v1339_v24 }
 0x1ac   : > { %2979 = vrcp.f32 %v3669_v25  ;;  %v900_v36 = vperm.slane %v868_v26, 0  ;;  %v841_v37 = vrot.slane %v3633_v31, 6  ;;  %vm1078_vm12 = vmor %vm1076_vm11, %vm1077_vm10  ;;  %v867_v38 = vadd.f32 1.01, %v837_v28 }
 0x1ad   : > { %647 = vrot.lane.b32.xlu1 %v630_v7, %s3124_s6  ;;  %v1079_v39 = vsel %vm1078_vm12, %v3650_v63, %v1075_v29  ;;  %v898_v40 = vperm.slane %v866_v30, 0  ;;  %v839_v41 = vrot.slane %v3633_v31, 4  ;;  %v1083_v42 = vor.u32 1.1754944e-38, %v1082_v32 }
 0x1ae   : > { %v1341_v43 = vmul.f32 %v3660_v0, %v1340_v33  ;;  %vm1081_vm13 = vcmp.eq.f32.partialorder %v1080_v35, 8.507059e+37  ;;  %v871_v45 = vadd.f32 1.01, %v841_v37  ;;  %v899_v48 = vperm.slane %v867_v38, 0 }
 0x1af   : > { %651 = vrot.lane.b32.xlu2 %v632_v21, %s3124_s6  ;;  %v3678_v34 = vpop.eup %2977  ;;  %v3692_v47 = vsel %vm1081_vm13, %v1083_v42, %v1079_v39  ;;  %v840_v50 = vrot.slane %v3633_v31, 5  ;;  %v869_v51 = vadd.f32 1.01, %v839_v41  ;;  %vm1344_vm14 = vweird.f32 %v3660_v0  ;;  %v1060_v41 = vpop.f32.mrf.mxu2 }
 0x1b0   : > { %v820_v44 = vmul.f32 %v3678_v34, %v3657_v14  ;;  %v1342_v52 = vadd.f32 %v3660_v0, %v1341_v43  ;;  %v1349_v54 = vand.u32 2147483648, %v3648_v60  ;;  %v903_v56 = vperm.slane %v871_v45, 0 }
 0x1b1   : > { %653 = vrot.lane.b32.xlu0 %v633_v1, %s3124_s6  ;;  %v1104_v57 = vrot.slane %v3692_v47, 2  ;;  %vm1343_vm15 = vweird.f32 %v3648_v60  ;;  %v1347_v58 = vand.u32 2147483647, %v3648_v60  ;;  %v870_v59 = vadd.f32 1.01, %v840_v50 }
 0x1b2   : > { %v3690_v46 = vpop.eup %2979  ;;  %v821_v53 = vsub.f32 1.0, %v820_v44  ;;  %vm1345_vm0 = vmor %vm1343_vm15, %vm1344_vm14  ;;  %v901_v61 = vperm.slane %v869_v51, 0  ;;  %v842_v62 = vrot.slane %v3633_v31, 7  ;;  %v1350_v2 = vor.u32 1.1754944e-38, %v1349_v54 }
 0x1b3   : > { %v551_v55 = vmul.f32 %v3690_v46, %v3669_v25  ;;  %v1346_v63 = vsel %vm1345_vm0, %v3660_v0, %v1342_v52  ;;  %v1134_v4 = vadd.f32 1.01, %v1104_v57  ;;  %vm1348_vm1 = vcmp.eq.f32.partialorder %v1347_v58, 8.507059e+37  ;;  %v1327_v58 = vpop.f32.mrf.mxu3 }
 0x1b4   : > { %v822_v1 = vmul.f32 %v3678_v34, %v821_v53  ;;  %v902_v5 = vperm.slane %v870_v59, 0  ;;  %v3709_v7 = vsel %vm1348_vm1, %v1350_v2, %v1346_v63  ;;  %v872_v60 = vadd.f32 1.01, %v842_v62 }
 0x1b5   : > { %655 = vrot.lane.b32.xlu1 %v634_v22, %s3124_s6  ;;  %v552_v3 = vsub.f32 1.0, %v551_v55  ;;  %vm825_vm2 = vweird.f32 %v3678_v34  ;;  %v830_v9 = vand.u32 2147483648, %v3657_v14  ;;  %v1166_v10 = vperm.slane %v1134_v4, 0 }
 0x1b6   : > { %v823_v8 = vadd.f32 %v3678_v34, %v822_v1  ;;  %v1107_v11 = vrot.slane %v3692_v47, 5  ;;  %vm824_vm3 = vweird.f32 %v3657_v14  ;;  %v828_v21 = vand.u32 2147483647, %v3657_v14 }
 0x1b7   : > { %657 = vrot.lane.b32.xlu2 %v635_v27, %s3124_s6  ;;  %v553_v31 = vmul.f32 %v3690_v46, %v552_v3  ;;  %v1399_v12 = vadd.f32 1.01, %v3709_v7  ;;  %vm826_vm4 = vmor %vm824_vm3, %vm825_vm2  ;;  %v904_v13 = vperm.slane %v872_v60, 0  ;;  %vm556_vm5 = vweird.f32 %v3690_v46 }
 0x1b8   : > { %v827_v15 = vsel %vm826_vm4, %v3678_v34, %v823_v8  ;;  %v831_v0 = vor.u32 1.1754944e-38, %v830_v9  ;;  %v561_v18 = vand.u32 2147483648, %v3669_v25  ;;  %vm829_vm6 = vcmp.eq.f32.partialorder %v828_v21, 8.507059e+37 }
 0x1b9   : > { %659 = vrot.lane.b32.xlu0 %v636_v17, %s3124_s6  ;;  %v554_v16 = vadd.f32 %v3690_v46, %v553_v31  ;;  %v1137_v17 = vadd.f32 1.01, %v1107_v11  ;;  %v1431_v14 = vperm.slane %v1399_v12, 0  ;;  %vm555_vm7 = vweird.f32 %v3669_v25 }
 0x1ba   : > { %v559_v19 = vand.u32 2147483647, %v3669_v25  ;;  %v3728_v20 = vsel %vm829_vm6, %v831_v0, %v827_v15  ;;  %v1132_v22 = vadd.f32 1.01, %v3692_v47  ;;  %vm557_vm8 = vmor %vm555_vm7, %vm556_vm5  ;;  %v1370_v26 = vrot.slane %v3709_v7, 1 }
 0x1bb   : > { %v558_v23 = vsel %vm557_vm8, %v3690_v46, %v554_v16  ;;  %v1169_v24 = vperm.slane %v1137_v17, 0  ;;  %v562_v27 = vor.u32 1.1754944e-38, %v561_v18  ;;  %v873_v28 = vadd.f32 1.01, %v3728_v20 }
 0x1bc   : > { %vm560_vm9 = vcmp.eq.f32.partialorder %v559_v19, 8.507059e+37  ;;  %v1164_v29 = vperm.slane %v1132_v22, 0  ;;  %v1400_v30 = vadd.f32 1.01, %v1370_v26  ;;  %v1103_v33 = vrot.slane %v3692_v47, 1 }
 0x1bd   : > { %915 = vrot.lane.b32.xlu1 %v898_v40, %s3124_s6  ;;  %v3736_v25 = vsel %vm560_vm9, %v562_v27, %v558_v23  ;;  %v905_v32 = vperm.slane %v873_v28, 0  ;;  %v1105_v39 = vrot.slane %v3692_v47, 3  ;;  %v1106_v43 = vrot.slane %v3692_v47, 4 }
 0x1be   : > { %v605_v34 = vadd.f32 1.01, %v3736_v25  ;;  %v1432_v35 = vperm.slane %v1400_v30, 0  ;;  %v1133_v37 = vadd.f32 1.01, %v1103_v33  ;;  %v1061_v45 = vadd.f32 %v1060_v41, %v3640_v49 }
 0x1bf   : > { %917 = vrot.lane.b32.xlu2 %v899_v48, %s3124_s6  ;;  %v1135_v44 = vadd.f32 1.01, %v1105_v39  ;;  %v1376_v48 = vrot.slane %v3709_v7, 7  ;;  %v1136_v50 = vadd.f32 1.01, %v1106_v43  ;;  %v1108_v52 = vrot.slane %v3692_v47, 6  ;;  %v1591_v43 = vpop.f32.mrf.mxu0 }
 0x1c0   : > { %v637_v38 = vperm.slane %v605_v34, 0  ;;  %v1165_v42 = vperm.slane %v1133_v37, 0  ;;  %v2742_v53 = vmul.f32 -1.442695, %v1061_v45  ;;  %v1328_v63 = vadd.f32 %v1327_v58, %v3640_v49 }
 0x1c1   : > { %919 = vrot.lane.b32.xlu0 %v900_v36, %s3124_s6  ;;  %v1373_v36 = vrot.slane %v3709_v7, 4  ;;  %v1167_v51 = vperm.slane %v1135_v44, 0  ;;  %v1406_v54 = vadd.f32 1.01, %v1376_v48  ;;  %v1168_v55 = vperm.slane %v1136_v50, 0 }
 0x1c2   : > { %v1138_v57 = vadd.f32 1.01, %v1108_v52  ;;  %2981 = vpow2.f32 %v2742_v53  ;;  %v1371_v2 = vrot.slane %v3709_v7, 2  ;;  %v1372_v4 = vrot.slane %v3709_v7, 3 }
 0x1c3   : > { %v1403_v40 = vadd.f32 1.01, %v1373_v36  ;;  %v1438_v59 = vperm.slane %v1406_v54, 0  ;;  %v2763_v60 = vmul.f32 -1.442695, %v1328_v63  ;;  %v578_v9 = vrot.slane %v3736_v25, 5 }
 0x1c4   : > { %v1170_v1 = vperm.slane %v1138_v57, 0  ;;  %v1401_v8 = vadd.f32 1.01, %v1371_v2  ;;  %v1402_v11 = vadd.f32 1.01, %v1372_v4  ;;  %v1374_v12 = vrot.slane %v3709_v7, 5 }
 0x1c5   : > { %921 = vrot.lane.b32.xlu1 %v901_v61, %s3124_s6  ;;  %v1435_v46 = vperm.slane %v1403_v40, 0  ;;  %v575_v61 = vrot.slane %v3736_v25, 2  ;;  %2983 = vpow2.f32 %v2763_v60  ;;  %v1375_v16 = vrot.slane %v3709_v7, 6 }
 0x1c6   : > { %v1433_v21 = vperm.slane %v1401_v8, 0  ;;  %v1434_v15 = vperm.slane %v1402_v11, 0  ;;  %v1404_v0 = vadd.f32 1.01, %v1374_v12  ;;  %vm694_vm10 = vcmask 131080  }
 0x1c7   : > { %923 = vrot.lane.b32.xlu2 %v902_v5, %s3124_s6  ;;  %v607_v3 = vadd.f32 1.01, %v575_v61  ;;  %v1405_v19 = vadd.f32 1.01, %v1375_v16  ;;  %v576_v23 = vrot.slane %v3736_v25, 3  ;;  %v846_v36 = vrot.slane %v3728_v20, 4 }
 0x1c8   : > { %v2982_v5 = vpop.eup %2981  ;;  %v1436_v22 = vperm.slane %v1404_v0, 0  ;;  %v579_v40 = vrot.slane %v3736_v25, 6  ;;  %v577_v45 = vrot.slane %v3736_v25, 4  ;;  %v849_v53 = vrot.slane %v3728_v20, 7 }
 0x1c9   : > { %925 = vrot.lane.b32.xlu0 %v903_v56, %s3124_s6  ;;  %v1109_v56 = vrot.slane %v3692_v47, 7  ;;  %v639_v31 = vperm.slane %v607_v3, 0  ;;  %v1437_v28 = vperm.slane %v1405_v19, 0  ;;  %v608_v33 = vadd.f32 1.01, %v576_v23 }
 0x1ca   : > { %v877_v41 = vadd.f32 1.01, %v846_v36  ;;  %v611_v48 = vadd.f32 1.01, %v579_v40  ;;  %v844_v58 = vrot.slane %v3728_v20, 2  ;;  %v580_v3 = vrot.slane %v3736_v25, 7 }
 0x1cb   : > { %v1139_v62 = vadd.f32 1.01, %v1109_v56  ;;  %v2984_v17 = vpop.eup %2983  ;;  %v640_v39 = vperm.slane %v608_v33, 0  ;;  %v847_v11 = vrot.slane %v3728_v20, 5  ;;  %v845_v16 = vrot.slane %v3728_v20, 3 }
 0x1cc   : > { %v3780_v26 = vadd.f32 1.0, %v2984_v17  ;;  %v909_v52 = vperm.slane %v877_v41, 0  ;;  %v643_v57 = vperm.slane %v611_v48, 0  ;;  %v875_v4 = vadd.f32 1.01, %v844_v58 }
 0x1cd   : > { %927 = vrot.lane.b32.xlu1 %v904_v13, %s3124_s6  ;;  %v1171_v47 = vperm.slane %v1139_v62, 0  ;;  %v610_v13 = vadd.f32 1.01, %v578_v9 }
 0x1ce   : > { %vm1358_vm0 = vweird.f32 %v3780_v26  ;;  %v1362_v17 = vand.u32 2147483647, %v3780_v26 }
 0x1cf   : > { %1447 = vrot.lane.b32.xlu2 %v1431_v14, %s3124_s6  ;;  %v642_v18 = vperm.slane %v610_v13, 0  ;;  %v843_v14 = vrot.slane %v3728_v20, 1  ;;  %v1364_v13 = vand.u32 2147483648, %v3780_v26 }
 0x1d0   : > { %vm1363_vm2 = vcmp.eq.f32.partialorder %v1362_v17, 8.507059e+37 }
 0x1d1   : > { %1184 = vrot.lane.b32.xlu0 %v1166_v10, %s3124_s6  ;;  %v3763_v10 = vadd.f32 1.0, %v2982_v5  ;;  %v874_v27 = vadd.f32 1.01, %v843_v14  ;;  %v1365_v23 = vor.u32 1.1754944e-38, %v1364_v13 }
 0x1d3   : > { %2985 = vrcp.f32 %v3763_v10  ;;  %v1097_v61 = vand.u32 2147483648, %v3763_v10  ;;  %vm1091_vm12 = vweird.f32 %v3763_v10 }
 0x1d4   : > { %2987 = vrcp.f32 %v3780_v26 }
 0x1d5   : > { %1180 = vrot.lane.b32.xlu1 %v1164_v29, %s3124_s6  ;;  %v574_v29 = vrot.slane %v3736_v25, 1  ;;  %v1098_v5 = vor.u32 1.1754944e-38, %v1097_v61  ;;  %v907_v25 = vperm.slane %v875_v4, 0 }
 0x1d7   : > { %929 = vrot.lane.b32.xlu2 %v905_v32, %s3124_s6  ;;  %v606_v37 = vadd.f32 1.01, %v574_v29 }
 0x1d9   : > { %1190 = vrot.lane.b32.xlu0 %v1169_v24, %s3124_s6  ;;  %v3778_v24 = vpop.eup %2985  ;;  %v638_v44 = vperm.slane %v606_v37, 0 }
 0x1da   : > { %v1087_v30 = vmul.f32 %v3778_v24, %v3763_v10  ;;  %vm1092_vm11 = vweird.f32 %v3778_v24 }
 0x1db   : > { %vm1093_vm13 = vmor %vm1091_vm12, %vm1092_vm11 }
 0x1dd   : > { %661 = vrot.lane.b32.xlu1 %v637_v38, %s3124_s6  ;;  %v1088_v38 = vsub.f32 1.0, %v1087_v30 }
 0x1df   : > { %1182 = vrot.lane.b32.xlu2 %v1165_v42, %s3124_s6  ;;  %v3798_v42 = vpop.eup %2987 }
 0x1e0   : > { %v1354_v50 = vmul.f32 %v3798_v42, %v3780_v26  ;;  %vm1359_vm15 = vweird.f32 %v3798_v42 }
 0x1e1   : > { %1449 = vrot.lane.b32.xlu0 %v1432_v35, %s3124_s6  ;;  %v906_v35 = vperm.slane %v874_v27, 0  ;;  %vm1360_vm1 = vmor %vm1358_vm0, %vm1359_vm15 }
 0x1e2   : > { %v1355_v62 = vsub.f32 1.0, %v1354_v50 }
 0x1e4   : > { %v1356_v60 = vmul.f32 %v3798_v42, %v1355_v62 }
 0x1e5   : > { %1186 = vrot.lane.b32.xlu1 %v1167_v51, %s3124_s6  ;;  %v1592_v51 = vadd.f32 %v1591_v43, %v3629_v6 }
 0x1e7   : > { %1188 = vrot.lane.b32.xlu2 %v1168_v55, %s3124_s6  ;;  %v609_v55 = vadd.f32 1.01, %v577_v45  ;;  %v2783_v63 = vmul.f32 -1.442695, %v1592_v51 }
 0x1e9   : > { %1455 = vrot.lane.b32.xlu0 %v1435_v46, %s3124_s6  ;;  %v1089_v46 = vmul.f32 %v3778_v24, %v1088_v38  ;;  %v641_v2 = vperm.slane %v609_v55, 0  ;;  %2989 = vpow2.f32 %v2783_v63 }
 0x1eb   : > { %v1090_v56 = vadd.f32 %v3778_v24, %v1089_v46 }
 0x1ed   : > { %1192 = vrot.lane.b32.xlu1 %v1170_v1, %s3124_s6  ;;  %v880_v1 = vadd.f32 1.01, %v849_v53 }
 0x1ef   : > { %1194 = vrot.lane.b32.xlu2 %v1171_v47, %s3124_s6  ;;  %v1094_v47 = vsel %vm1093_vm13, %v3778_v24, %v1090_v56  ;;  %v912_v8 = vperm.slane %v880_v1, 0  ;;  %v2990_v0 = vpop.eup %2989  ;;  %v1594_v24 = vpop.f32.mrf.mxu0 }
 0x1f0   : > { %v1595_v30 = vadd.f32 %v1594_v24, %v3640_v49 }
 0x1f1   : > { %1461 = vrot.lane.b32.xlu0 %v1438_v59, %s3124_s6  ;;  %v1095_v59 = vand.u32 2147483647, %v3763_v10  ;;  %v612_v10 = vadd.f32 1.01, %v580_v3 }
 0x1f2   : > { %v2784_v38 = vmul.f32 -1.442695, %v1595_v30 }
 0x1f3   : > { %vm1096_vm14 = vcmp.eq.f32.partialorder %v1095_v59, 8.507059e+37 }
 0x1f5   : > { %1451 = vrot.lane.b32.xlu1 %v1433_v21, %s3124_s6  ;;  %v1357_v21 = vadd.f32 %v3798_v42, %v1356_v60 }
 0x1f7   : > { %1453 = vrot.lane.b32.xlu2 %v1434_v15, %s3124_s6  ;;  %v644_v15 = vperm.slane %v612_v10, 0  ;;  %v1361_v14 = vsel %vm1360_vm1, %v3798_v42, %v1357_v21  ;;  %v1858_v10 = vpop.f32.mrf.mxu1 }
 0x1f8   : > { %v3843_v29 = vsel %vm1363_vm2, %v1365_v23, %v1361_v14 }
 0x1f9   : > { %665 = vrot.lane.b32.xlu0 %v639_v31, %s3124_s6  ;;  %v3821_v31 = vsel %vm1096_vm14, %v1098_v5, %v1094_v47  ;;  %v1407_v37 = vadd.f32 1.01, %v3843_v29  ;;  %v1378_v55 = vrot.slane %v3843_v29, 2 }
 0x1fa   : > { %v1140_v12 = vadd.f32 1.01, %v3821_v31  ;;  %v1115_v40 = vrot.slane %v3821_v31, 6  ;;  %v1110_v43 = vrot.slane %v3821_v31, 1  ;;  %v1111_v50 = vrot.slane %v3821_v31, 2 }
 0x1fb   : > { %v1113_v62 = vrot.slane %v3821_v31, 4  ;;  %v1409_v1 = vadd.f32 1.01, %v1378_v55  ;;  %v1114_v47 = vrot.slane %v3821_v31, 5  ;;  %v1116_v13 = vrot.slane %v3821_v31, 7 }
 0x1fc   : > { %v1172_v19 = vperm.slane %v1140_v12, 0  ;;  %v1146_v46 = vadd.f32 1.01, %v1115_v40  ;;  %v1141_v53 = vadd.f32 1.01, %v1110_v43 }
 0x1fd   : > { %1457 = vrot.lane.b32.xlu1 %v1436_v22, %s3124_s6  ;;  %v1112_v22 = vrot.slane %v3821_v31, 3  ;;  %v1144_v60 = vadd.f32 1.01, %v1113_v62  ;;  %v1377_v31 = vrot.slane %v3843_v29, 1  ;;  %v1147_v23 = vadd.f32 1.01, %v1116_v13 }
 0x1fe   : > { %v1173_v61 = vperm.slane %v1141_v53, 0 }
 0x1ff   : > { %1459 = vrot.lane.b32.xlu2 %v1437_v28, %s3124_s6  ;;  %v876_v28 = vadd.f32 1.01, %v845_v16  ;;  %v1143_v33 = vadd.f32 1.01, %v1112_v22  ;;  %v1176_v12 = vperm.slane %v1144_v60, 0 }
 0x201   : > { %671 = vrot.lane.b32.xlu0 %v642_v18, %s3124_s6  ;;  %v650_v32 = vpop.permute.xlu2 %649  ;;  %v878_v18 = vadd.f32 1.01, %v847_v11  ;;  %v1145_v11 = vadd.f32 1.01, %v1114_v47 }
 0x202   : > { %2704 = vst.msk [vmem:[%s3775_s25 + $0x31] sm:$0x1] %vm694_vm10, %v650_v32 }
 0x203   : > { %v910_v26 = vperm.slane %v878_v18, 0  ;;  %v1177_v14 = vperm.slane %v1145_v11, 0 }
 0x205   : > { %667 = vrot.lane.b32.xlu1 %v640_v39, %s3124_s6  ;;  %v1175_v39 = vperm.slane %v1143_v33, 0 }
 0x207   : > { %663 = vrot.lane.b32.xlu2 %v638_v44, %s3124_s6 }
 0x209   : > { %931 = vrot.lane.b32.xlu0 %v906_v35, %s3124_s6  ;;  %v652_v54 = vpop.permute.xlu2 %651  ;;  %v848_v35 = vrot.slane %v3728_v20, 6  ;;  %v1439_v20 = vperm.slane %v1407_v37, 0 }
 0x20a   : > { %2705 = vst.msk [vmem:[%s3775_s25 + $0x49] sm:$0x1] %vm694_vm10, %v652_v54  ;;  %v1178_v54 = vperm.slane %v1146_v46, 0 }
 0x20b   : > { %v879_v42 = vadd.f32 1.01, %v848_v35  ;;  %v1379_v35 = vrot.slane %v3843_v29, 3 }
 0x20d   : > { %673 = vrot.lane.b32.xlu1 %v643_v57, %s3124_s6  ;;  %v911_v48 = vperm.slane %v879_v42, 0  ;;  %v1142_v57 = vadd.f32 1.01, %v1111_v50  ;;  %v1410_v42 = vadd.f32 1.01, %v1379_v35 }
 0x20f   : > { %669 = vrot.lane.b32.xlu2 %v641_v2, %s3124_s6  ;;  %v1174_v3 = vperm.slane %v1142_v57, 0  ;;  %v1442_v50 = vperm.slane %v1410_v42, 0  ;;  %v1383_v57 = vrot.slane %v3843_v29, 7 }
 0x211   : > { %937 = vrot.lane.b32.xlu0 %v909_v52, %s3124_s6  ;;  %v658_v9 = vpop.permute.xlu2 %657 }
 0x212   : > { %2708 = vst.msk [vmem:[%s3775_s25 + $0x91] sm:$0x1] %vm694_vm10, %v658_v9  ;;  %v1381_v9 = vrot.slane %v3843_v29, 5 }
 0x214   : > { %v1412_v18 = vadd.f32 1.01, %v1381_v9 }
 0x215   : > { %933 = vrot.lane.b32.xlu1 %v907_v25, %s3124_s6 }
 0x217   : > { %v646_v34 = vpop.permute.xlu1 %645  ;;  %675 = vrot.lane.b32.xlu2 %v644_v15, %s3124_s6 }
 0x218   : > { %2702 = vst.msk [vmem:[%s3775_s25 + $0x1] sm:$0x1] %vm694_vm10, %v646_v34  ;;  %v908_v34 = vperm.slane %v876_v28, 0  ;;  %v1444_v28 = vperm.slane %v1412_v18, 0 }
 0x219   : > { %943 = vrot.lane.b32.xlu0 %v912_v8, %s3124_s6  ;;  %v918_v27 = vpop.permute.xlu2 %917  ;;  %v1441_v8 = vperm.slane %v1409_v1, 0 }
 0x21a   : > { %2725 = vst.msk [vmem:[%s3775_s25 + $0x32] sm:$0x1] %vm694_vm10, %v918_v27 }
 0x21b   : > { %v914_v7 = vpop.permute.xlu0 %913 }
 0x21c   : > { %2723 = vst.msk [vmem:[%s3775_s25 + $0x2] sm:$0x1] %vm694_vm10, %v914_v7  ;;  %v3838_v7 = vadd.f32 1.0, %v2990_v0  ;;  %v1859_v0 = vadd.f32 %v1858_v10, %v3629_v6 }
 0x21d   : > { %939 = vrot.lane.b32.xlu1 %v910_v26, %s3124_s6 }
 0x21e   : > { %2991 = vrcp.f32 %v3838_v7  ;;  %v1616_v15 = vand.u32 2147483648, %v3838_v7  ;;  %vm1610_vm4 = vweird.f32 %v3838_v7  ;;  %v1614_v16 = vand.u32 2147483647, %v3838_v7 }
 0x21f   : > { %v648_v36 = vpop.permute.xlu1 %647  ;;  %935 = vrot.lane.b32.xlu2 %v908_v34, %s3124_s6  ;;  %2993 = vpow2.f32 %v2784_v38  ;;  %v2804_v27 = vmul.f32 -1.442695, %v1859_v0  ;;  %v1179_v34 = vperm.slane %v1147_v23, 0 }
 0x220   : > { %2703 = vst.msk [vmem:[%s3775_s25 + $0x19] sm:$0x1] %vm694_vm10, %v648_v36  ;;  %vm1615_vm6 = vcmp.eq.f32.partialorder %v1614_v16, 8.507059e+37 }
 0x221   : > { %1196 = vrot.lane.b32.xlu0 %v1172_v19, %s3124_s6  ;;  %v924_v41 = vpop.permute.xlu2 %923 }
 0x222   : > { %2728 = vst.msk [vmem:[%s3775_s25 + $0x7a] sm:$0x1] %vm694_vm10, %v924_v41 }
 0x223   : > { %v654_v32 = vpop.permute.xlu0 %653 }
 0x224   : > { %2706 = vst.msk [vmem:[%s3775_s25 + $0x61] sm:$0x1] %vm694_vm10, %v654_v32  ;;  %v3860_v44 = vpop.eup %2991  ;;  %v1408_v32 = vadd.f32 1.01, %v1377_v31 }
 0x225   : > { %1463 = vrot.lane.b32.xlu1 %v1439_v20, %s3124_s6  ;;  %v1606_v51 = vmul.f32 %v3860_v44, %v3838_v7  ;;  %v2994_v58 = vpop.eup %2993  ;;  %vm1611_vm3 = vweird.f32 %v3860_v44  ;;  %v1617_v7 = vor.u32 1.1754944e-38, %v1616_v15 }
 0x226   : > { %v3877_v2 = vadd.f32 1.0, %v2994_v58  ;;  %vm1612_vm5 = vmor %vm1610_vm4, %vm1611_vm3  ;;  %v1440_v38 = vperm.slane %v1408_v32, 0 }
 0x227   : > { %v656_v52 = vpop.permute.xlu1 %655  ;;  %941 = vrot.lane.b32.xlu2 %v911_v48, %s3124_s6  ;;  %v1607_v59 = vsub.f32 1.0, %v1606_v51  ;;  %v1382_v51 = vrot.slane %v3843_v29, 6 }
 0x228   : > { %2707 = vst.msk [vmem:[%s3775_s25 + $0x79] sm:$0x1] %vm694_vm10, %v656_v52  ;;  %2995 = vrcp.f32 %v3877_v2  ;;  %v1861_v52 = vpop.f32.mrf.mxu1  ;;  %v1631_v62 = vand.u32 2147483648, %v3877_v2  ;;  %vm1625_vm8 = vweird.f32 %v3877_v2  ;;  %v1629_v1 = vand.u32 2147483647, %v3877_v2 }
 0x229   : > { %1202 = vrot.lane.b32.xlu0 %v1175_v39, %s3124_s6  ;;  %v1448_v56 = vpop.permute.xlu2 %1447  ;;  %v1608_v4 = vmul.f32 %v3860_v44, %v1607_v59  ;;  %2997 = vpow2.f32 %v2804_v27  ;;  %v1380_v39 = vrot.slane %v3843_v29, 4 }
 0x22a   : > { %2765 = vst.msk [vmem:[%s3775_s25 + $0x4] sm:$0x1] %vm694_vm10, %v1448_v56  ;;  %vm1630_vm11 = vcmp.eq.f32.partialorder %v1629_v1, 8.507059e+37 }
 0x22b   : > { %v660_v45 = vpop.permute.xlu0 %659  ;;  %v1609_v21 = vadd.f32 %v3860_v44, %v1608_v4  ;;  %v1414_v4 = vadd.f32 1.01, %v1383_v57 }
 0x22c   : > { %2709 = vst.msk [vmem:[%s3775_s25 + $0xa9] sm:$0x1] %vm694_vm10, %v660_v45  ;;  %v1411_v45 = vadd.f32 1.01, %v1380_v39 }
 0x22d   : > { %1198 = vrot.lane.b32.xlu1 %v1173_v61, %s3124_s6  ;;  %v1613_v19 = vsel %vm1612_vm5, %v3860_v44, %v1609_v21  ;;  %v1413_v61 = vadd.f32 1.01, %v1382_v51  ;;  %v1446_v21 = vperm.slane %v1414_v4, 0 }
 0x22e   : > { %v3903_v24 = vpop.eup %2995  ;;  %v3908_v26 = vsel %vm1615_vm6, %v1617_v7, %v1613_v19  ;;  %v1443_v56 = vperm.slane %v1411_v45, 0 }
 0x22f   : > { %v916_v5 = vpop.permute.xlu1 %915  ;;  %1200 = vrot.lane.b32.xlu2 %v1174_v3, %s3124_s6  ;;  %v1621_v33 = vmul.f32 %v3903_v24, %v3877_v2  ;;  %v1666_v37 = vadd.f32 1.01, %v3908_v26  ;;  %v1639_v43 = vrot.slane %v3908_v26, 3  ;;  %v2998_v46 = vpop.eup %2997  ;;  %vm1626_vm7 = vweird.f32 %v3903_v24 }
 0x230   : > { %2724 = vst.msk [vmem:[%s3775_s25 + $0x1a] sm:$0x1] %vm694_vm10, %v916_v5  ;;  %v3931_v55 = vadd.f32 1.0, %v2998_v46  ;;  %v1642_v3 = vrot.slane %v3908_v26, 6  ;;  %vm1627_vm9 = vmor %vm1625_vm8, %vm1626_vm7  ;;  %v1445_v60 = vperm.slane %v1413_v61, 0  ;;  %v1632_v2 = vor.u32 1.1754944e-38, %v1631_v62 }
 0x231   : > { %1208 = vrot.lane.b32.xlu0 %v1178_v54, %s3124_s6  ;;  %v930_v25 = vpop.permute.xlu2 %929  ;;  %v1622_v40 = vsub.f32 1.0, %v1621_v33  ;;  %v1698_v20 = vperm.slane %v1666_v37, 0  ;;  %v1669_v54 = vadd.f32 1.01, %v1639_v43  ;;  %v1641_v27 = vrot.slane %v3908_v26, 5 }
 0x232   : > { %2731 = vst.msk [vmem:[%s3775_s25 + $0xc2] sm:$0x1] %vm694_vm10, %v930_v25  ;;  %2999 = vrcp.f32 %v3931_v55  ;;  %v1672_v25 = vadd.f32 1.01, %v1642_v3  ;;  %v1643_v42 = vrot.slane %v3908_v26, 7  ;;  %vm1877_vm13 = vweird.f32 %v3931_v55 }
 0x233   : > { %v920_v63 = vpop.permute.xlu0 %919  ;;  %v1623_v48 = vmul.f32 %v3903_v24, %v1622_v40  ;;  %v1701_v29 = vperm.slane %v1669_v54, 0  ;;  %v1671_v39 = vadd.f32 1.01, %v1641_v27 }
 0x234   : > { %2726 = vst.msk [vmem:[%s3775_s25 + $0x4a] sm:$0x1] %vm694_vm10, %v920_v63  ;;  %v1862_v63 = vadd.f32 %v1861_v52, %v3640_v49  ;;  %v1704_v0 = vperm.slane %v1672_v25, 0  ;;  %v1881_v52 = vand.u32 2147483647, %v3931_v55 }
 0x235   : > { %1204 = vrot.lane.b32.xlu1 %v1176_v12, %s3124_s6  ;;  %v1624_v58 = vadd.f32 %v3903_v24, %v1623_v48  ;;  %v1638_v12 = vrot.slane %v3908_v26, 2  ;;  %v1703_v45 = vperm.slane %v1671_v39, 0 }
 0x236   : > { %v2805_v9 = vmul.f32 -1.442695, %v1862_v63  ;;  %vm1882_vm15 = vcmp.eq.f32.partialorder %v1881_v52, 8.507059e+37 }
 0x237   : > { %v922_v22 = vpop.permute.xlu1 %921  ;;  %1206 = vrot.lane.b32.xlu2 %v1177_v14, %s3124_s6  ;;  %v1628_v5 = vsel %vm1627_vm9, %v3903_v24, %v1624_v58  ;;  %v1668_v14 = vadd.f32 1.01, %v1638_v12 }
 0x238   : > { %2727 = vst.msk [vmem:[%s3775_s25 + $0x62] sm:$0x1] %vm694_vm10, %v922_v22  ;;  %v3953_v11 = vsel %vm1630_vm11, %v1632_v2, %v1628_v5  ;;  %v3958_v16 = vpop.eup %2999  ;;  %3001 = vpow2.f32 %v2805_v9  ;;  %v1640_v22 = vrot.slane %v3908_v26, 4 }
 0x239   : > { %1467 = vrot.lane.b32.xlu0 %v1441_v8, %s3124_s6  ;;  %v1183_v30 = vpop.permute.xlu2 %1182  ;;  %v1637_v8 = vrot.slane %v3908_v26, 1  ;;  %v1873_v31 = vmul.f32 %v3958_v16, %v3931_v55  ;;  %v1700_v7 = vperm.slane %v1668_v14, 0  ;;  %vm1878_vm12 = vweird.f32 %v3958_v16 }
 0x23a   : > { %2745 = vst.msk [vmem:[%s3775_s25 + $0x1b] sm:$0x1] %vm694_vm10, %v1183_v30  ;;  %v1670_v33 = vadd.f32 1.01, %v1640_v22  ;;  %v1883_v26 = vand.u32 2147483648, %v3931_v55  ;;  %v1650_v54 = vrot.slane %v3953_v11, 7  ;;  %vm3999_vm14 = vmor %vm1877_vm13, %vm1878_vm12 }
 0x23b   : > { %v926_v17 = vpop.permute.xlu0 %925  ;;  %v1667_v15 = vadd.f32 1.01, %v1637_v8  ;;  %v1874_v30 = vsub.f32 1.0, %v1873_v31  ;;  %v1674_v58 = vadd.f32 1.01, %v3953_v11  ;;  %v1645_v61 = vrot.slane %v3953_v11, 2 }
 0x23c   : > { %2729 = vst.msk [vmem:[%s3775_s25 + $0x92] sm:$0x1] %vm694_vm10, %v926_v17  ;;  %v1644_v17 = vrot.slane %v3953_v11, 1  ;;  %v1884_v63 = vor.u32 1.1754944e-38, %v1883_v26  ;;  %v1646_v4 = vrot.slane %v3953_v11, 3  ;;  %v1649_v14 = vrot.slane %v3953_v11, 6 }
 0x23d   : > { %1210 = vrot.lane.b32.xlu1 %v1179_v34, %s3124_s6  ;;  %v1699_v19 = vperm.slane %v1667_v15, 0  ;;  %v2125_v34 = vpop.f32.mrf.mxu2  ;;  %v1875_v40 = vmul.f32 %v3958_v16, %v1874_v30  ;;  %v1676_v8 = vadd.f32 1.01, %v1645_v61  ;;  %v1648_v15 = vrot.slane %v3953_v11, 5 }
 0x23e   : > { %v1675_v24 = vadd.f32 1.01, %v1644_v17  ;;  %v1677_v25 = vadd.f32 1.01, %v1646_v4 }
 0x23f   : > { %v928_v41 = vpop.permute.xlu1 %927  ;;  %1465 = vrot.lane.b32.xlu2 %v1440_v38, %s3124_s6  ;;  %v1876_v46 = vadd.f32 %v3958_v16, %v1875_v40  ;;  %v1679_v22 = vadd.f32 1.01, %v1648_v15 }
 0x240   : > { %2730 = vst.msk [vmem:[%s3775_s25 + $0xaa] sm:$0x1] %vm694_vm10, %v928_v41  ;;  %v1707_v35 = vperm.slane %v1675_v24, 0  ;;  %v1702_v41 = vperm.slane %v1670_v33, 0 }
 0x241   : > { %1473 = vrot.lane.b32.xlu0 %v1444_v28, %s3124_s6  ;;  %v1189_v44 = vpop.permute.xlu2 %1188  ;;  %v3002_v28 = vpop.eup %3001 }
 0x242   : > { %2748 = vst.msk [vmem:[%s3775_s25 + $0x63] sm:$0x1] %vm694_vm10, %v1189_v44  ;;  %v3978_v37 = vadd.f32 1.0, %v3002_v28  ;;  %v1680_v28 = vadd.f32 1.01, %v1649_v14 }
 0x243   : > { %v1185_v36 = vpop.permute.xlu0 %1184 }
 0x244   : > { %2746 = vst.msk [vmem:[%s3775_s25 + $0x33] sm:$0x1] %vm694_vm10, %v1185_v36  ;;  %v1647_v36 = vrot.slane %v3953_v11, 4  ;;  %3003 = vrcp.f32 %v3978_v37  ;;  %v1711_v11 = vperm.slane %v1679_v22, 0  ;;  %vm1892_vm1 = vweird.f32 %v3978_v37 }
 0x245   : > { %1469 = vrot.lane.b32.xlu1 %v1442_v50, %s3124_s6  ;;  %v1673_v50 = vadd.f32 1.01, %v1643_v42  ;;  %v1896_v33 = vand.u32 2147483647, %v3978_v37 }
 0x246   : > { %v1678_v44 = vadd.f32 1.01, %v1647_v36 }
 0x247   : > { %v1181_v59 = vpop.permute.xlu1 %1180  ;;  %1471 = vrot.lane.b32.xlu2 %v1443_v56, %s3124_s6  ;;  %v1705_v55 = vperm.slane %v1673_v50, 0  ;;  %vm1897_vm3 = vcmp.eq.f32.partialorder %v1896_v33, 8.507059e+37 }
 0x248   : > { %2744 = vst.msk [vmem:[%s3775_s25 + $0x3] sm:$0x1] %vm694_vm10, %v1181_v59  ;;  %v1880_v59 = vsel %vm3999_vm14, %v3958_v16, %v1876_v46 }
 0x249   : > { %1714 = vrot.lane.b32.xlu0 %v1698_v20, %s3124_s6  ;;  %v1195_v47 = vpop.permute.xlu2 %1194  ;;  %v2126_v20 = vadd.f32 %v2125_v34, %v3629_v6  ;;  %v4014_v3 = vsel %vm1882_vm15, %v1884_v63, %v1880_v59 }
 0x24a   : > { %2751 = vst.msk [vmem:[%s3775_s25 + $0xab] sm:$0x1] %vm694_vm10, %v1195_v47  ;;  %v4011_v62 = vpop.eup %3003  ;;  %v1706_v47 = vperm.slane %v1674_v58, 0  ;;  %v1905_v9 = vrot.slane %v4014_v3, 2  ;;  %v1908_v24 = vrot.slane %v4014_v3, 5  ;;  %v1904_v39 = vrot.slane %v4014_v3, 1 }
 0x24b   : > { %v1191_v53 = vpop.permute.xlu0 %1190  ;;  %v2825_v51 = vmul.f32 -1.442695, %v2126_v20  ;;  %v1888_v5 = vmul.f32 %v4011_v62, %v3978_v37  ;;  %vm1893_vm0 = vweird.f32 %v4011_v62  ;;  %v1933_v42 = vadd.f32 1.01, %v4014_v3 }
 0x24c   : > { %2749 = vst.msk [vmem:[%s3775_s25 + $0x7b] sm:$0x1] %vm694_vm10, %v1191_v53  ;;  %v1710_v53 = vperm.slane %v1678_v44, 0  ;;  %v1938_v36 = vadd.f32 1.01, %v1908_v24  ;;  %vm1894_vm2 = vmor %vm1892_vm1, %vm1893_vm0  ;;  %v1907_v56 = vrot.slane %v4014_v3, 4 }
 0x24d   : > { %1475 = vrot.lane.b32.xlu1 %v1445_v60, %s3124_s6  ;;  %3005 = vpow2.f32 %v2825_v51  ;;  %v1889_v12 = vsub.f32 1.0, %v1888_v5  ;;  %v1965_v26 = vperm.slane %v1933_v42, 0  ;;  %v1906_v51 = vrot.slane %v4014_v3, 3  ;;  %v2392_v5 = vpop.f32.mrf.mxu3 }
 0x24e   : > { %v1970_v44 = vperm.slane %v1938_v36, 0  ;;  %v1937_v63 = vadd.f32 1.01, %v1907_v56  ;;  %v1909_v4 = vrot.slane %v4014_v3, 6  ;;  %v2393_v15 = vadd.f32 %v2392_v5, %v3629_v6 }
 0x24f   : > { %v662_v13 = vpop.permute.xlu1 %661  ;;  %1477 = vrot.lane.b32.xlu2 %v1446_v21, %s3124_s6  ;;  %v1890_v31 = vmul.f32 %v4011_v62, %v1889_v12  ;;  %v1936_v59 = vadd.f32 1.01, %v1906_v51 }
 0x250   : > { %2710 = vst.msk [vmem:[%s3775_s25 + $0xc1] sm:$0x1] %vm694_vm10, %v662_v13  ;;  %v1708_v13 = vperm.slane %v1676_v8, 0  ;;  %v1939_v12 = vadd.f32 1.01, %v1909_v4 }
 0x251   : > { %1720 = vrot.lane.b32.xlu0 %v1701_v29, %s3124_s6  ;;  %v1454_v18 = vpop.permute.xlu2 %1453  ;;  %v1681_v29 = vadd.f32 1.01, %v1650_v54  ;;  %v1891_v30 = vadd.f32 %v4011_v62, %v1890_v31 }
 0x252   : > { %2768 = vst.msk [vmem:[%s3775_s25 + $0x4c] sm:$0x1] %vm694_vm10, %v1454_v18  ;;  %v1709_v18 = vperm.slane %v1677_v25, 0 }
 0x253   : > { %v1450_v10 = vpop.permute.xlu0 %1449  ;;  %v1713_v2 = vperm.slane %v1681_v29, 0  ;;  %v3006_v21 = vpop.eup %3005  ;;  %v1895_v40 = vsel %vm1894_vm2, %v4011_v62, %v1891_v30 }
 0x254   : > { %2766 = vst.msk [vmem:[%s3775_s25 + $0x1c] sm:$0x1] %vm694_vm10, %v1450_v10  ;;  %v4030_v17 = vadd.f32 1.0, %v3006_v21 }
 0x255   : > { %1716 = vrot.lane.b32.xlu1 %v1699_v19, %s3124_s6 }
 0x256   : > { %3007 = vrcp.f32 %v4030_v17  ;;  %vm2144_vm5 = vweird.f32 %v4030_v17 }
 0x257   : > { %v1187_v32 = vpop.permute.xlu1 %1186  ;;  %1718 = vrot.lane.b32.xlu2 %v1700_v7, %s3124_s6  ;;  %v2128_v7 = vpop.f32.mrf.mxu2 }
 0x258   : > { %2747 = vst.msk [vmem:[%s3775_s25 + $0x4b] sm:$0x1] %vm694_vm10, %v1187_v32  ;;  %v1898_v32 = vand.u32 2147483648, %v3978_v37  ;;  %v2129_v34 = vadd.f32 %v2128_v7, %v3640_v49 }
 0x259   : > { %1726 = vrot.lane.b32.xlu0 %v1704_v0, %s3124_s6  ;;  %v1460_v38 = vpop.permute.xlu2 %1459  ;;  %v1935_v0 = vadd.f32 1.01, %v1905_v9  ;;  %v1969_v9 = vperm.slane %v1937_v63, 0 }
 0x25a   : > { %2771 = vst.msk [vmem:[%s3775_s25 + $0x94] sm:$0x1] %vm694_vm10, %v1460_v38  ;;  %v1712_v38 = vperm.slane %v1680_v28, 0  ;;  %v1899_v37 = vor.u32 1.1754944e-38, %v1898_v32 }
 0x25b   : > { %v1456_v23 = vpop.permute.xlu0 %1455 }
 0x25c   : > { %2769 = vst.msk [vmem:[%s3775_s25 + $0x64] sm:$0x1] %vm694_vm10, %v1456_v23  ;;  %v1967_v23 = vperm.slane %v1935_v0, 0  ;;  %v4056_v20 = vpop.eup %3007 }
 0x25d   : > { %1722 = vrot.lane.b32.xlu1 %v1702_v41, %s3124_s6  ;;  %v2140_v50 = vmul.f32 %v4056_v20, %v4030_v17  ;;  %vm2145_vm4 = vweird.f32 %v4056_v20 }
 0x25e   : > { %vm4099_vm6 = vmor %vm2144_vm5, %vm2145_vm4 }
 0x25f   : > { %v1193_v48 = vpop.permute.xlu1 %1192  ;;  %1724 = vrot.lane.b32.xlu2 %v1703_v45, %s3124_s6  ;;  %v4061_v45 = vsel %vm1897_vm3, %v1899_v37, %v1895_v40 }
 0x260   : > { %2750 = vst.msk [vmem:[%s3775_s25 + $0x93] sm:$0x1] %vm694_vm10, %v1193_v48  ;;  %v1934_v48 = vadd.f32 1.01, %v1904_v39  ;;  %v1913_v61 = vrot.slane %v4061_v45, 3  ;;  %v1916_v0 = vrot.slane %v4061_v45, 6 }
 0x261   : > { %1732 = vrot.lane.b32.xlu0 %v1707_v35, %s3124_s6  ;;  %v664_v57 = vpop.permute.xlu2 %663  ;;  %v1912_v30 = vrot.slane %v4061_v45, 2 }
 0x262   : > { %2711 = vst.msk [vmem:[%s3775_s25 + $0xd9] sm:$0x1] %vm694_vm10, %v664_v57  ;;  %v1966_v54 = vperm.slane %v1934_v48, 0  ;;  %v2141_v57 = vsub.f32 1.0, %v2140_v50  ;;  %v1944_v8 = vadd.f32 1.01, %v1913_v61 }
 0x263   : > { %v1462_v43 = vpop.permute.xlu0 %1461  ;;  %v1947_v7 = vadd.f32 1.01, %v1916_v0 }
 0x264   : > { %2772 = vst.msk [vmem:[%s3775_s25 + $0xac] sm:$0x1] %vm694_vm10, %v1462_v43  ;;  %v2826_v43 = vmul.f32 -1.442695, %v2129_v34  ;;  %v2142_v29 = vmul.f32 %v4056_v20, %v2141_v57 }
 0x265   : > { %1728 = vrot.lane.b32.xlu1 %v1705_v55, %s3124_s6  ;;  %v1979_v34 = vperm.slane %v1947_v7, 0 }
 0x266   : > { %3009 = vpow2.f32 %v2826_v43  ;;  %v2143_v25 = vadd.f32 %v4056_v20, %v2142_v29  ;;  %v1915_v43 = vrot.slane %v4061_v45, 5 }
 0x267   : > { %v1452_v60 = vpop.permute.xlu1 %1451  ;;  %1730 = vrot.lane.b32.xlu2 %v1706_v47, %s3124_s6  ;;  %v1968_v47 = vperm.slane %v1936_v59, 0  ;;  %v1917_v59 = vrot.slane %v4061_v45, 7 }
 0x268   : > { %2767 = vst.msk [vmem:[%s3775_s25 + $0x34] sm:$0x1] %vm694_vm10, %v1452_v60  ;;  %v2147_v31 = vsel %vm4099_vm6, %v4056_v20, %v2143_v25  ;;  %v1946_v56 = vadd.f32 1.01, %v1915_v43 }
 0x269   : > { %1738 = vrot.lane.b32.xlu0 %v1710_v53, %s3124_s6  ;;  %v670_v10 = vpop.permute.xlu2 %669  ;;  %v1941_v53 = vadd.f32 1.01, %v4061_v45 }
 0x26a   : > { %2714 = vst.msk [vmem:[%s3775_s25 + $0x121] sm:$0x1] %vm694_vm10, %v670_v10  ;;  %v1910_v10 = vrot.slane %v4014_v3, 7  ;;  %v1976_v3 = vperm.slane %v1944_v8, 0  ;;  %v1978_v63 = vperm.slane %v1946_v56, 0 }
 0x26b   : > { %v666_v1 = vpop.permute.xlu0 %665  ;;  %v1973_v55 = vperm.slane %v1941_v53, 0  ;;  %v2395_v53 = vpop.f32.mrf.mxu3 }
 0x26c   : > { %2712 = vst.msk [vmem:[%s3775_s25 + $0xf1] sm:$0x1] %vm694_vm10, %v666_v1  ;;  %v3010_v1 = vpop.eup %3009  ;;  %v1940_v6 = vadd.f32 1.01, %v1910_v10 }
 0x26d   : > { %1734 = vrot.lane.b32.xlu1 %v1708_v13, %s3124_s6  ;;  %v2150_v13 = vand.u32 2147483648, %v4030_v17 }
 0x26e   : > { %v1972_v28 = vperm.slane %v1940_v6, 0 }
 0x26f   : > { %v1458_v19 = vpop.permute.xlu1 %1457  ;;  %1736 = vrot.lane.b32.xlu2 %v1709_v18, %s3124_s6  ;;  %v2151_v22 = vor.u32 1.1754944e-38, %v2150_v13 }
 0x270   : > { %2770 = vst.msk [vmem:[%s3775_s25 + $0x7c] sm:$0x1] %vm694_vm10, %v1458_v19  ;;  %v1911_v19 = vrot.slane %v4061_v45, 1 }
 0x271   : > { %1744 = vrot.lane.b32.xlu0 %v1713_v2, %s3124_s6  ;;  %v676_v27 = vpop.permute.xlu2 %675  ;;  %v4084_v2 = vadd.f32 1.0, %v3010_v1 }
 0x272   : > { %2717 = vst.msk [vmem:[%s3775_s25 + $0x169] sm:$0x1] %vm694_vm10, %v676_v27  ;;  %v1942_v32 = vadd.f32 1.01, %v1911_v19 }
 0x273   : > { %v672_v16 = vpop.permute.xlu0 %671  ;;  %3011 = vrcp.f32 %v4084_v2  ;;  %vm2159_vm9 = vweird.f32 %v4084_v2 }
 0x274   : > { %2715 = vst.msk [vmem:[%s3775_s25 + $0x139] sm:$0x1] %vm694_vm10, %v672_v16  ;;  %v2148_v16 = vand.u32 2147483647, %v4030_v17  ;;  %v1971_v17 = vperm.slane %v1939_v12, 0  ;;  %v1974_v40 = vperm.slane %v1942_v32, 0 }
 0x275   : > { %1740 = vrot.lane.b32.xlu1 %v1711_v11, %s3124_s6 }
 0x276   : > { %vm2149_vm7 = vcmp.eq.f32.partialorder %v2148_v16, 8.507059e+37 }
 0x277   : > { %v668_v41 = vpop.permute.xlu1 %667  ;;  %1742 = vrot.lane.b32.xlu2 %v1712_v38, %s3124_s6  ;;  %v4112_v27 = vsel %vm2149_vm7, %v2151_v22, %v2147_v31  ;;  %v1943_v38 = vadd.f32 1.01, %v1912_v30 }
 0x278   : > { %2713 = vst.msk [vmem:[%s3775_s25 + $0x109] sm:$0x1] %vm694_vm10, %v668_v41  ;;  %v1914_v41 = vrot.slane %v4061_v45, 4  ;;  %v2174_v51 = vrot.slane %v4112_v27, 4  ;;  %v2163_v45 = vand.u32 2147483647, %v4084_v2 }
 0x279   : > { %1985 = vrot.lane.b32.xlu0 %v1967_v23, %s3124_s6  ;;  %v936_v46 = vpop.permute.xlu2 %935  ;;  %v2846_v23 = vmul.f32 -1.442695, %v2393_v15  ;;  %v4117_v33 = vpop.eup %3011  ;;  %v1975_v37 = vperm.slane %v1943_v38, 0  ;;  %v2200_v10 = vadd.f32 1.01, %v4112_v27  ;;  %v2173_v18 = vrot.slane %v4112_v27, 3 }
 0x27a   : > { %2734 = vst.msk [vmem:[%s3775_s25 + $0x10a] sm:$0x1] %vm694_vm10, %v936_v46  ;;  %v2155_v39 = vmul.f32 %v4117_v33, %v4084_v2  ;;  %v1945_v50 = vadd.f32 1.01, %v1914_v41  ;;  %vm2160_vm8 = vweird.f32 %v4117_v33  ;;  %vm2164_vm12 = vcmp.eq.f32.partialorder %v2163_v45, 8.507059e+37 }
 0x27b   : > { %v932_v35 = vpop.permute.xlu0 %931  ;;  %3013 = vpow2.f32 %v2846_v23  ;;  %vm4158_vm11 = vmor %vm2159_vm9, %vm2160_vm8  ;;  %v2232_v0 = vperm.slane %v2200_v10, 0  ;;  %v2203_v23 = vadd.f32 1.01, %v2173_v18  ;;  %v2175_v30 = vrot.slane %v4112_v27, 5 }
 0x27c   : > { %2732 = vst.msk [vmem:[%s3775_s25 + $0xda] sm:$0x1] %vm694_vm10, %v932_v35  ;;  %v2171_v35 = vrot.slane %v4112_v27, 1  ;;  %v2156_v46 = vsub.f32 1.0, %v2155_v39 }
 0x27d   : > { %1981 = vrot.lane.b32.xlu1 %v1965_v26, %s3124_s6  ;;  %v2205_v39 = vadd.f32 1.01, %v2175_v30 }
 0x27e   : > { %v2201_v20 = vadd.f32 1.01, %v2171_v35  ;;  %v2157_v57 = vmul.f32 %v4117_v33, %v2156_v46  ;;  %v2176_v35 = vrot.slane %v4112_v27, 6 }
 0x27f   : > { %v674_v58 = vpop.permute.xlu1 %673  ;;  %1983 = vrot.lane.b32.xlu2 %v1966_v54, %s3124_s6 }
 0x280   : > { %2716 = vst.msk [vmem:[%s3775_s25 + $0x151] sm:$0x1] %vm694_vm10, %v674_v58  ;;  %v2233_v26 = vperm.slane %v2201_v20, 0  ;;  %v1977_v58 = vperm.slane %v1945_v50, 0  ;;  %v2158_v1 = vadd.f32 %v4117_v33, %v2157_v57  ;;  %v2206_v20 = vadd.f32 1.01, %v2176_v35 }
 0x281   : > { %1991 = vrot.lane.b32.xlu0 %v1970_v44, %s3124_s6  ;;  %v942_v62 = vpop.permute.xlu2 %941  ;;  %v3014_v44 = vpop.eup %3013 }
 0x282   : > { %2737 = vst.msk [vmem:[%s3775_s25 + $0x152] sm:$0x1] %vm694_vm10, %v942_v62  ;;  %v2204_v62 = vadd.f32 1.01, %v2174_v51  ;;  %v2162_v25 = vsel %vm4158_vm11, %v4117_v33, %v2158_v1  ;;  %v2238_v50 = vperm.slane %v2206_v20, 0 }
 0x283   : > { %v938_v52 = vpop.permute.xlu0 %937 }
 0x284   : > { %2735 = vst.msk [vmem:[%s3775_s25 + $0x122] sm:$0x1] %vm694_vm10, %v938_v52  ;;  %v4137_v52 = vadd.f32 1.0, %v3014_v44  ;;  %v2236_v5 = vperm.slane %v2204_v62, 0 }
 0x285   : > { %1987 = vrot.lane.b32.xlu1 %v1968_v47, %s3124_s6  ;;  %v1948_v47 = vadd.f32 1.01, %v1917_v59 }
 0x286   : > { %3015 = vrcp.f32 %v4137_v52  ;;  %v2417_v43 = vand.u32 2147483648, %v4137_v52  ;;  %vm2411_vm14 = vweird.f32 %v4137_v52  ;;  %v2415_v44 = vand.u32 2147483647, %v4137_v52 }
 0x287   : > { %v934_v21 = vpop.permute.xlu1 %933  ;;  %1989 = vrot.lane.b32.xlu2 %v1969_v9, %s3124_s6 }
 0x288   : > { %2733 = vst.msk [vmem:[%s3775_s25 + $0xf2] sm:$0x1] %vm694_vm10, %v934_v21  ;;  %v2172_v21 = vrot.slane %v4112_v27, 2  ;;  %v2418_v57 = vor.u32 1.1754944e-38, %v2417_v43  ;;  %vm2416_vm0 = vcmp.eq.f32.partialorder %v2415_v44, 8.507059e+37 }
 0x289   : > { %1997 = vrot.lane.b32.xlu0 %v1973_v55, %s3124_s6  ;;  %v1201_v14 = vpop.permute.xlu2 %1200  ;;  %v2396_v55 = vadd.f32 %v2395_v53, %v3640_v49  ;;  %v2165_v49 = vand.u32 2147483648, %v4084_v2  ;;  %v1980_v2 = vperm.slane %v1948_v47, 0 }
 0x28a   : > { %2754 = vst.msk [vmem:[%s3775_s25 + $0xf3] sm:$0x1] %vm694_vm10, %v1201_v14  ;;  %v2202_v31 = vadd.f32 1.01, %v2172_v21 }
 0x28b   : > { %v944_v60 = vpop.permute.xlu0 %943  ;;  %v2847_v4 = vmul.f32 -1.442695, %v2396_v55  ;;  %v2166_v13 = vor.u32 1.1754944e-38, %v2165_v49 }
 0x28c   : > { %2738 = vst.msk [vmem:[%s3775_s25 + $0x16a] sm:$0x1] %vm694_vm10, %v944_v60  ;;  %v2177_v60 = vrot.slane %v4112_v27, 7  ;;  %v4170_v12 = vpop.eup %3015  ;;  %v2237_v27 = vperm.slane %v2205_v39, 0 }
 0x28d   : > { %1993 = vrot.lane.b32.xlu1 %v1971_v17, %s3124_s6  ;;  %3017 = vpow2.f32 %v2847_v4  ;;  %v2407_v14 = vmul.f32 %v4170_v12, %v4137_v52  ;;  %vm2412_vm13 = vweird.f32 %v4170_v12 }
 0x28e   : > { %v2207_v16 = vadd.f32 1.01, %v2177_v60  ;;  %vm2413_vm15 = vmor %vm2411_vm14, %vm2412_vm13 }
 0x28f   : > { %v940_v11 = vpop.permute.xlu1 %939  ;;  %1995 = vrot.lane.b32.xlu2 %v1972_v28, %s3124_s6  ;;  %v2408_v7 = vsub.f32 1.0, %v2407_v14  ;;  %v2234_v28 = vperm.slane %v2202_v31, 0 }
 0x290   : > { %2736 = vst.msk [vmem:[%s3775_s25 + $0x13a] sm:$0x1] %vm694_vm10, %v940_v11  ;;  %v2239_v17 = vperm.slane %v2207_v16, 0 }
 0x291   : > { %2003 = vrot.lane.b32.xlu0 %v1976_v3, %s3124_s6  ;;  %v1207_v36 = vpop.permute.xlu2 %1206  ;;  %v4173_v3 = vsel %vm2164_vm12, %v2166_v13, %v2162_v25 }
 0x292   : > { %2757 = vst.msk [vmem:[%s3775_s25 + $0x13b] sm:$0x1] %vm694_vm10, %v1207_v36  ;;  %v2179_v19 = vrot.slane %v4173_v3, 2  ;;  %v2409_v36 = vmul.f32 %v4170_v12, %v2408_v7  ;;  %v2182_v41 = vrot.slane %v4173_v3, 5  ;;  %v2181_v49 = vrot.slane %v4173_v3, 4 }
 0x293   : > { %v1197_v24 = vpop.permute.xlu0 %1196  ;;  %v2183_v21 = vrot.slane %v4173_v3, 6  ;;  %v2184_v16 = vrot.slane %v4173_v3, 7 }
 0x294   : > { %2752 = vst.msk [vmem:[%s3775_s25 + $0xc3] sm:$0x1] %vm694_vm10, %v1197_v24  ;;  %v3018_v24 = vpop.eup %3017  ;;  %v2210_v32 = vadd.f32 1.01, %v2179_v19  ;;  %v2212_v10 = vadd.f32 1.01, %v2181_v49 }
 0x295   : > { %1999 = vrot.lane.b32.xlu1 %v1974_v40, %s3124_s6  ;;  %v4189_v33 = vadd.f32 1.0, %v3018_v24  ;;  %v2214_v14 = vadd.f32 1.01, %v2183_v21 }
 0x296   : > { %v2242_v40 = vperm.slane %v2210_v32, 0 }
 0x297   : > { %v1464_v48 = vpop.permute.xlu1 %1463  ;;  %2001 = vrot.lane.b32.xlu2 %v1975_v37, %s3124_s6  ;;  %3019 = vrcp.f32 %v4189_v33  ;;  %v2410_v37 = vadd.f32 %v4170_v12, %v2409_v36  ;;  %vm2426_vm2 = vweird.f32 %v4189_v33  ;;  %v2430_v31 = vand.u32 2147483647, %v4189_v33 }
 0x298   : > { %2773 = vst.msk [vmem:[%s3775_s25 + $0xc4] sm:$0x1] %vm694_vm10, %v1464_v48  ;;  %v2213_v48 = vadd.f32 1.01, %v2182_v41  ;;  %v2246_v24 = vperm.slane %v2214_v14, 0 }
 0x299   : > { %2009 = vrot.lane.b32.xlu0 %v1979_v34, %s3124_s6  ;;  %v1466_v54 = vpop.permute.xlu2 %1465  ;;  %v2235_v34 = vperm.slane %v2203_v23, 0  ;;  %v2414_v51 = vsel %vm2413_vm15, %v4170_v12, %v2410_v37  ;;  %vm2431_vm4 = vcmp.eq.f32.partialorder %v2430_v31, 8.507059e+37 }
 0x29a   : > { %2774 = vst.msk [vmem:[%s3775_s25 + $0xdc] sm:$0x1] %vm694_vm10, %v1466_v54  ;;  %v2208_v54 = vadd.f32 1.01, %v4173_v3  ;;  %v2245_v52 = vperm.slane %v2213_v48, 0 }
 0x29b   : > { %v1203_v42 = vpop.permute.xlu0 %1202 }
 0x29c   : > { %2755 = vst.msk [vmem:[%s3775_s25 + $0x10b] sm:$0x1] %vm694_vm10, %v1203_v42  ;;  %v2240_v62 = vperm.slane %v2208_v54, 0 }
 0x29d   : > { %2005 = vrot.lane.b32.xlu1 %v1977_v58, %s3124_s6  ;;  %v4214_v56 = vpop.eup %3019  ;;  %v4219_v58 = vsel %vm2416_vm0, %v2418_v57, %v2414_v51 }
 0x29e   : > { %v2440_v8 = vrot.slane %v4219_v58, 3  ;;  %vm2427_vm1 = vweird.f32 %v4214_v56  ;;  %v2438_v7 = vrot.slane %v4219_v58, 1  ;;  %v2441_v20 = vrot.slane %v4219_v58, 4 }
 0x29f   : > { %v1199_v29 = vpop.permute.xlu1 %1198  ;;  %2007 = vrot.lane.b32.xlu2 %v1978_v63, %s3124_s6  ;;  %v2180_v63 = vrot.slane %v4173_v3, 3  ;;  %vm2428_vm3 = vmor %vm2426_vm2, %vm2427_vm1  ;;  %v2442_v44 = vrot.slane %v4219_v58, 5 }
 0x2a0   : > { %2753 = vst.msk [vmem:[%s3775_s25 + $0xdb] sm:$0x1] %vm694_vm10, %v1199_v29  ;;  %v2467_v29 = vadd.f32 1.01, %v4219_v58  ;;  %v2470_v13 = vadd.f32 1.01, %v2440_v8 }
 0x2a1   : > { %2250 = vrot.lane.b32.xlu0 %v2233_v26, %s3124_s6  ;;  %v1472_v9 = vpop.permute.xlu2 %1471  ;;  %v2178_v26 = vrot.slane %v4173_v3, 1  ;;  %v2443_v3 = vrot.slane %v4219_v58, 6  ;;  %v2468_v36 = vadd.f32 1.01, %v2438_v7  ;;  %v2471_v48 = vadd.f32 1.01, %v2441_v20 }
 0x2a2   : > { %2777 = vst.msk [vmem:[%s3775_s25 + $0x124] sm:$0x1] %vm694_vm10, %v1472_v9  ;;  %v2499_v60 = vperm.slane %v2467_v29, 0 }
 0x2a3   : > { %v1209_v61 = vpop.permute.xlu0 %1208  ;;  %v2209_v55 = vadd.f32 1.01, %v2178_v26  ;;  %v2503_v54 = vperm.slane %v2471_v48, 0 }
 0x2a4   : > { %2758 = vst.msk [vmem:[%s3775_s25 + $0x153] sm:$0x1] %vm694_vm10, %v1209_v61  ;;  %v2422_v61 = vmul.f32 %v4214_v56, %v4189_v33 }
 0x2a5   : > { %2011 = vrot.lane.b32.xlu1 %v1980_v2, %s3124_s6  ;;  %v2241_v47 = vperm.slane %v2209_v55, 0 }
 0x2a6   : > { %v2423_v45 = vsub.f32 1.0, %v2422_v61 }
 0x2a7   : > { %v1205_v6 = vpop.permute.xlu1 %1204  ;;  %2248 = vrot.lane.b32.xlu2 %v2232_v0, %s3124_s6 }
 0x2a8   : > { %2756 = vst.msk [vmem:[%s3775_s25 + $0x123] sm:$0x1] %vm694_vm10, %v1205_v6  ;;  %v2424_v25 = vmul.f32 %v4214_v56, %v2423_v45  ;;  %v2432_v6 = vand.u32 2147483648, %v4189_v33 }
 0x2a9   : > { %2256 = vrot.lane.b32.xlu0 %v2236_v5, %s3124_s6  ;;  %v1478_v22 = vpop.permute.xlu2 %1477  ;;  %v2211_v5 = vadd.f32 1.01, %v2180_v63 }
 0x2aa   : > { %2780 = vst.msk [vmem:[%s3775_s25 + $0x16c] sm:$0x1] %vm694_vm10, %v1478_v22  ;;  %v2425_v0 = vadd.f32 %v4214_v56, %v2424_v25  ;;  %v2215_v22 = vadd.f32 1.01, %v2184_v16 }
 0x2ab   : > { %v1468_v15 = vpop.permute.xlu0 %1467  ;;  %v2243_v2 = vperm.slane %v2211_v5, 0 }
 0x2ac   : > { %2775 = vst.msk [vmem:[%s3775_s25 + $0xf4] sm:$0x1] %vm694_vm10, %v1468_v15  ;;  %v2244_v15 = vperm.slane %v2212_v10, 0  ;;  %v2429_v23 = vsel %vm2428_vm3, %v4214_v56, %v2425_v0  ;;  %v2247_v33 = vperm.slane %v2215_v22, 0  ;;  %v2444_v56 = vrot.slane %v4219_v58, 7 }
 0x2ad   : > { %2252 = vrot.lane.b32.xlu1 %v2234_v28, %s3124_s6  ;;  %v2433_v28 = vor.u32 1.1754944e-38, %v2432_v6 }
 0x2ae   : > { %v2474_v61 = vadd.f32 1.01, %v2444_v56 }
 0x2af   : > { %v1211_v38 = vpop.permute.xlu1 %1210  ;;  %2254 = vrot.lane.b32.xlu2 %v2235_v34, %s3124_s6  ;;  %v4260_v32 = vsel %vm2431_vm4, %v2433_v28, %v2429_v23  ;;  %v2439_v34 = vrot.slane %v4219_v58, 2 }
 0x2b0   : > { %2759 = vst.msk [vmem:[%s3775_s25 + $0x16b] sm:$0x1] %vm694_vm10, %v1211_v38  ;;  %v2445_v39 = vrot.slane %v4260_v32, 1  ;;  %v2448_v26 = vrot.slane %v4260_v32, 4  ;;  %v2451_v63 = vrot.slane %v4260_v32, 7  ;;  %v2506_v29 = vperm.slane %v2474_v61, 0 }
 0x2b1   : > { %2262 = vrot.lane.b32.xlu0 %v2239_v17, %s3124_s6  ;;  %v1719_v42 = vpop.permute.xlu2 %1718  ;;  %v2502_v17 = vperm.slane %v2470_v13, 0  ;;  %v2469_v41 = vadd.f32 1.01, %v2439_v34  ;;  %v2475_v58 = vadd.f32 1.01, %v4260_v32  ;;  %v2447_v5 = vrot.slane %v4260_v32, 3 }
 0x2b2   : > { %2788 = vst.msk [vmem:[%s3775_s25 + $0x35] sm:$0x1] %vm694_vm10, %v1719_v42  ;;  %v2500_v42 = vperm.slane %v2468_v36, 0  ;;  %v2482_v45 = vadd.f32 1.01, %v2451_v63  ;;  %v2449_v21 = vrot.slane %v4260_v32, 5 }
 0x2b3   : > { %v1474_v11 = vpop.permute.xlu0 %1473  ;;  %v2501_v43 = vperm.slane %v2469_v41, 0  ;;  %v2478_v25 = vadd.f32 1.01, %v2447_v5 }
 0x2b4   : > { %2778 = vst.msk [vmem:[%s3775_s25 + $0x13c] sm:$0x1] %vm694_vm10, %v1474_v11  ;;  %v2473_v11 = vadd.f32 1.01, %v2443_v3  ;;  %v2480_v0 = vadd.f32 1.01, %v2449_v21 }
 0x2b5   : > { %2258 = vrot.lane.b32.xlu1 %v2237_v27, %s3124_s6  ;;  %v2476_v27 = vadd.f32 1.01, %v2445_v39  ;;  %v2510_v13 = vperm.slane %v2478_v25, 0 }
 0x2b6   : > { %v2505_v38 = vperm.slane %v2473_v11, 0  ;;  %v2512_v6 = vperm.slane %v2480_v0, 0 }
 0x2b7   : > { %v1470_v53 = vpop.permute.xlu1 %1469  ;;  %2260 = vrot.lane.b32.xlu2 %v2238_v50, %s3124_s6  ;;  %v2508_v50 = vperm.slane %v2476_v27, 0 }
 0x2b8   : > { %2776 = vst.msk [vmem:[%s3775_s25 + $0x10c] sm:$0x1] %vm694_vm10, %v1470_v53  ;;  %v2472_v53 = vadd.f32 1.01, %v2442_v44 }
 0x2b9   : > { %2268 = vrot.lane.b32.xlu0 %v2242_v40, %s3124_s6  ;;  %v1725_v59 = vpop.permute.xlu2 %1724 }
 0x2ba   : > { %2791 = vst.msk [vmem:[%s3775_s25 + $0x7d] sm:$0x1] %vm694_vm10, %v1725_v59  ;;  %v2504_v59 = vperm.slane %v2472_v53, 0 }
 0x2bb   : > { %v1715_v46 = vpop.permute.xlu0 %1714 }
 0x2bc   : > { %2786 = vst.msk [vmem:[%s3775_s25 + $0x5] sm:$0x1] %vm694_vm10, %v1715_v46 }
 0x2bd   : > { %2264 = vrot.lane.b32.xlu1 %v2240_v62, %s3124_s6 }
 0x2bf   : > { %v1476_v4 = vpop.permute.xlu1 %1475  ;;  %2266 = vrot.lane.b32.xlu2 %v2241_v47, %s3124_s6  ;;  %v2446_v47 = vrot.slane %v4260_v32, 2 }
 0x2c0   : > { %2779 = vst.msk [vmem:[%s3775_s25 + $0x154] sm:$0x1] %vm694_vm10, %v1476_v4  ;;  %v2507_v4 = vperm.slane %v2475_v58, 0 }
 0x2c1   : > { %2274 = vrot.lane.b32.xlu0 %v2245_v52, %s3124_s6  ;;  %v1731_v9 = vpop.permute.xlu2 %1730  ;;  %v2479_v52 = vadd.f32 1.01, %v2448_v26  ;;  %v2477_v8 = vadd.f32 1.01, %v2446_v47 }
 0x2c2   : > { %2794 = vst.msk [vmem:[%s3775_s25 + $0xc5] sm:$0x1] %vm694_vm10, %v1731_v9  ;;  %v2514_v9 = vperm.slane %v2482_v45, 0 }
 0x2c3   : > { %v1721_v1 = vpop.permute.xlu0 %1720  ;;  %v2511_v62 = vperm.slane %v2479_v52, 0 }
 0x2c4   : > { %2789 = vst.msk [vmem:[%s3775_s25 + $0x4d] sm:$0x1] %vm694_vm10, %v1721_v1 }
 0x2c5   : > { %2270 = vrot.lane.b32.xlu1 %v2243_v2, %s3124_s6  ;;  %v2509_v2 = vperm.slane %v2477_v8, 0 }
 0x2c7   : > { %v1717_v18 = vpop.permute.xlu1 %1716  ;;  %2272 = vrot.lane.b32.xlu2 %v2244_v15, %s3124_s6  ;;  %v2450_v15 = vrot.slane %v4260_v32, 6 }
 0x2c8   : > { %2787 = vst.msk [vmem:[%s3775_s25 + $0x1d] sm:$0x1] %vm694_vm10, %v1717_v18 }
 0x2c9   : > { %2515 = vrot.lane.b32.xlu0 %v2499_v60, %s3124_s6  ;;  %v1737_v19 = vpop.permute.xlu2 %1736  ;;  %v2481_v14 = vadd.f32 1.01, %v2450_v15 }
 0x2ca   : > { %2797 = vst.msk [vmem:[%s3775_s25 + $0x10d] sm:$0x1] %vm694_vm10, %v1737_v19 }
 0x2cb   : > { %v1727_v12 = vpop.permute.xlu0 %1726 }
 0x2cc   : > { %2792 = vst.msk [vmem:[%s3775_s25 + $0x95] sm:$0x1] %vm694_vm10, %v1727_v12 }
 0x2cd   : > { %2276 = vrot.lane.b32.xlu1 %v2246_v24, %s3124_s6 }
 0x2cf   : > { %v1723_v35 = vpop.permute.xlu1 %1722  ;;  %2278 = vrot.lane.b32.xlu2 %v2247_v33, %s3124_s6 }
 0x2d0   : > { %2790 = vst.msk [vmem:[%s3775_s25 + $0x65] sm:$0x1] %vm694_vm10, %v1723_v35 }
 0x2d1   : > { %2521 = vrot.lane.b32.xlu0 %v2502_v17, %s3124_s6  ;;  %v1743_v40 = vpop.permute.xlu2 %1742  ;;  %v2513_v17 = vperm.slane %v2481_v14, 0 }
 0x2d2   : > { %2800 = vst.msk [vmem:[%s3775_s25 + $0x155] sm:$0x1] %vm694_vm10, %v1743_v40 }
 0x2d3   : > { %v1733_v30 = vpop.permute.xlu0 %1732 }
 0x2d4   : > { %2795 = vst.msk [vmem:[%s3775_s25 + $0xdd] sm:$0x1] %vm694_vm10, %v1733_v30 }
 0x2d5   : > { %2517 = vrot.lane.b32.xlu1 %v2500_v42, %s3124_s6 }
 0x2d7   : > { %v1729_v46 = vpop.permute.xlu1 %1728  ;;  %2519 = vrot.lane.b32.xlu2 %v2501_v43, %s3124_s6 }
 0x2d8   : > { %2793 = vst.msk [vmem:[%s3775_s25 + $0xad] sm:$0x1] %vm694_vm10, %v1729_v46 }
 0x2d9   : > { %2527 = vrot.lane.b32.xlu0 %v2505_v38, %s3124_s6  ;;  %v1984_v51 = vpop.permute.xlu2 %1983 }
 0x2da   : > { %2808 = vst.msk [vmem:[%s3775_s25 + $0x1e] sm:$0x1] %vm694_vm10, %v1984_v51 }
 0x2db   : > { %v1739_v37 = vpop.permute.xlu0 %1738 }
 0x2dc   : > { %2798 = vst.msk [vmem:[%s3775_s25 + $0x125] sm:$0x1] %vm694_vm10, %v1739_v37 }
 0x2dd   : > { %2523 = vrot.lane.b32.xlu1 %v2503_v54, %s3124_s6 }
 0x2df   : > { %v1735_v55 = vpop.permute.xlu1 %1734  ;;  %2525 = vrot.lane.b32.xlu2 %v2504_v59, %s3124_s6 }
 0x2e0   : > { %2796 = vst.msk [vmem:[%s3775_s25 + $0xf5] sm:$0x1] %vm694_vm10, %v1735_v55 }
 0x2e1   : > { %2533 = vrot.lane.b32.xlu0 %v2508_v50, %s3124_s6  ;;  %v1990_v1 = vpop.permute.xlu2 %1989 }
 0x2e2   : > { %2811 = vst.msk [vmem:[%s3775_s25 + $0x66] sm:$0x1] %vm694_vm10, %v1990_v1 }
 0x2e3   : > { %v1745_v57 = vpop.permute.xlu0 %1744 }
 0x2e4   : > { %2801 = vst.msk [vmem:[%s3775_s25 + $0x16d] sm:$0x1] %vm694_vm10, %v1745_v57 }
 0x2e5   : > { %2529 = vrot.lane.b32.xlu1 %v2506_v29, %s3124_s6 }
 0x2e7   : > { %v1741_v60 = vpop.permute.xlu1 %1740  ;;  %2531 = vrot.lane.b32.xlu2 %v2507_v4, %s3124_s6 }
 0x2e8   : > { %2799 = vst.msk [vmem:[%s3775_s25 + $0x13d] sm:$0x1] %vm694_vm10, %v1741_v60 }
 0x2e9   : > { %2539 = vrot.lane.b32.xlu0 %v2511_v62, %s3124_s6  ;;  %v1996_v10 = vpop.permute.xlu2 %1995 }
 0x2ea   : > { %2814 = vst.msk [vmem:[%s3775_s25 + $0xae] sm:$0x1] %vm694_vm10, %v1996_v10 }
 0x2eb   : > { %v1986_v49 = vpop.permute.xlu0 %1985 }
 0x2ec   : > { %2809 = vst.msk [vmem:[%s3775_s25 + $0x36] sm:$0x1] %vm694_vm10, %v1986_v49 }
 0x2ed   : > { %2535 = vrot.lane.b32.xlu1 %v2509_v2, %s3124_s6 }
 0x2ef   : > { %v1982_v16 = vpop.permute.xlu1 %1981  ;;  %2537 = vrot.lane.b32.xlu2 %v2510_v13, %s3124_s6 }
 0x2f0   : > { %2807 = vst.msk [vmem:[%s3775_s25 + $0x6] sm:$0x1] %vm694_vm10, %v1982_v16 }
 0x2f1   : > { %2545 = vrot.lane.b32.xlu0 %v2514_v9, %s3124_s6  ;;  %v2002_v18 = vpop.permute.xlu2 %2001 }
 0x2f2   : > { %2817 = vst.msk [vmem:[%s3775_s25 + $0xf6] sm:$0x1] %vm694_vm10, %v2002_v18 }
 0x2f3   : > { %v1992_v12 = vpop.permute.xlu0 %1991 }
 0x2f4   : > { %2812 = vst.msk [vmem:[%s3775_s25 + $0x7e] sm:$0x1] %vm694_vm10, %v1992_v12 }
 0x2f5   : > { %2541 = vrot.lane.b32.xlu1 %v2512_v6, %s3124_s6 }
 0x2f7   : > { %v1988_v3 = vpop.permute.xlu1 %1987  ;;  %2543 = vrot.lane.b32.xlu2 %v2513_v17, %s3124_s6 }
 0x2f8   : > { %2810 = vst.msk [vmem:[%s3775_s25 + $0x4e] sm:$0x1] %vm694_vm10, %v1988_v3 }
 0x2f9   : > { %v2008_v19 = vpop.permute.xlu2 %2007 }
 0x2fa   : > { %2820 = vst.msk [vmem:[%s3775_s25 + $0x13e] sm:$0x1] %vm694_vm10, %v2008_v19 }
 0x2fb   : > { %v1998_v31 = vpop.permute.xlu0 %1997 }
 0x2fc   : > { %2815 = vst.msk [vmem:[%s3775_s25 + $0xc6] sm:$0x1] %vm694_vm10, %v1998_v31 }
 0x2ff   : > { %v1994_v23 = vpop.permute.xlu1 %1993 }
 0x300   : > { %2813 = vst.msk [vmem:[%s3775_s25 + $0x96] sm:$0x1] %vm694_vm10, %v1994_v23 }
 0x301   : > { %v2249_v24 = vpop.permute.xlu2 %2248 }
 0x302   : > { %2828 = vst.msk [vmem:[%s3775_s25 + $0x7] sm:$0x1] %vm694_vm10, %v2249_v24 }
 0x303   : > { %v2004_v22 = vpop.permute.xlu0 %2003 }
 0x304   : > { %2818 = vst.msk [vmem:[%s3775_s25 + $0x10e] sm:$0x1] %vm694_vm10, %v2004_v22 }
 0x307   : > { %v2000_v28 = vpop.permute.xlu1 %1999 }
 0x308   : > { %2816 = vst.msk [vmem:[%s3775_s25 + $0xde] sm:$0x1] %vm694_vm10, %v2000_v28 }
 0x309   : > { %v2255_v30 = vpop.permute.xlu2 %2254 }
 0x30a   : > { %2831 = vst.msk [vmem:[%s3775_s25 + $0x4f] sm:$0x1] %vm694_vm10, %v2255_v30 }
 0x30b   : > { %v2010_v7 = vpop.permute.xlu0 %2009 }
 0x30c   : > { %2821 = vst.msk [vmem:[%s3775_s25 + $0x156] sm:$0x1] %vm694_vm10, %v2010_v7 }
 0x30f   : > { %v2006_v32 = vpop.permute.xlu1 %2005 }
 0x310   : > { %2819 = vst.msk [vmem:[%s3775_s25 + $0x126] sm:$0x1] %vm694_vm10, %v2006_v32 }
 0x311   : > { %v2261_v33 = vpop.permute.xlu2 %2260 }
 0x312   : > { %2834 = vst.msk [vmem:[%s3775_s25 + $0x97] sm:$0x1] %vm694_vm10, %v2261_v33 }
 0x313   : > { %v2251_v11 = vpop.permute.xlu0 %2250 }
 0x314   : > { %2829 = vst.msk [vmem:[%s3775_s25 + $0x1f] sm:$0x1] %vm694_vm10, %v2251_v11 }
 0x317   : > { %v2012_v35 = vpop.permute.xlu1 %2011 }
 0x318   : > { %2822 = vst.msk [vmem:[%s3775_s25 + $0x16e] sm:$0x1] %vm694_vm10, %v2012_v35 }
 0x319   : > { %v2267_v36 = vpop.permute.xlu2 %2266 }
 0x31a   : > { %2837 = vst.msk [vmem:[%s3775_s25 + $0xdf] sm:$0x1] %vm694_vm10, %v2267_v36 }
 0x31b   : > { %v2257_v34 = vpop.permute.xlu0 %2256 }
 0x31c   : > { %2832 = vst.msk [vmem:[%s3775_s25 + $0x67] sm:$0x1] %vm694_vm10, %v2257_v34 }
 0x31f   : > { %v2253_v39 = vpop.permute.xlu1 %2252 }
 0x320   : > { %2830 = vst.msk [vmem:[%s3775_s25 + $0x37] sm:$0x1] %vm694_vm10, %v2253_v39 }
 0x321   : > { %v2273_v40 = vpop.permute.xlu2 %2272 }
 0x322   : > { %2840 = vst.msk [vmem:[%s3775_s25 + $0x127] sm:$0x1] %vm694_vm10, %v2273_v40 }
 0x323   : > { %v2263_v38 = vpop.permute.xlu0 %2262 }
 0x324   : > { %2835 = vst.msk [vmem:[%s3775_s25 + $0xaf] sm:$0x1] %vm694_vm10, %v2263_v38 }
 0x327   : > { %v2259_v42 = vpop.permute.xlu1 %2258 }
 0x328   : > { %2833 = vst.msk [vmem:[%s3775_s25 + $0x7f] sm:$0x1] %vm694_vm10, %v2259_v42 }
 0x329   : > { %v2279_v20 = vpop.permute.xlu2 %2278 }
 0x32a   : > { %2843 = vst.msk [vmem:[%s3775_s25 + $0x16f] sm:$0x1] %vm694_vm10, %v2279_v20 }
 0x32b   : > { %v2269_v41 = vpop.permute.xlu0 %2268 }
 0x32c   : > { %2838 = vst.msk [vmem:[%s3775_s25 + $0xf7] sm:$0x1] %vm694_vm10, %v2269_v41 }
 0x32f   : > { %v2265_v27 = vpop.permute.xlu1 %2264 }
 0x330   : > { %2836 = vst.msk [vmem:[%s3775_s25 + $0xc7] sm:$0x1] %vm694_vm10, %v2265_v27 }
 0x331   : > { %v2520_v43 = vpop.permute.xlu2 %2519 }
 0x332   : > { %2851 = vst.msk [vmem:[%s3775_s25 + $0x38] sm:$0x1] %vm694_vm10, %v2520_v43 }
 0x333   : > { %v2275_v37 = vpop.permute.xlu0 %2274 }
 0x334   : > { %2841 = vst.msk [vmem:[%s3775_s25 + $0x13f] sm:$0x1] %vm694_vm10, %v2275_v37 }
 0x337   : > { %v2271_v46 = vpop.permute.xlu1 %2270 }
 0x338   : > { %2839 = vst.msk [vmem:[%s3775_s25 + $0x10f] sm:$0x1] %vm694_vm10, %v2271_v46 }
 0x339   : > { %v2526_v48 = vpop.permute.xlu2 %2525 }
 0x33a   : > { %2854 = vst.msk [vmem:[%s3775_s25 + $0x80] sm:$0x1] %vm694_vm10, %v2526_v48 }
 0x33b   : > { %v2516_v44 = vpop.permute.xlu0 %2515 }
 0x33c   : > { %2849 = vst.msk [vmem:[%s3775_s25 + $0x8] sm:$0x1] %vm694_vm10, %v2516_v44 }
 0x33f   : > { %v2277_v26 = vpop.permute.xlu1 %2276 }
 0x340   : > { %2842 = vst.msk [vmem:[%s3775_s25 + $0x157] sm:$0x1] %vm694_vm10, %v2277_v26 }
 0x341   : > { %v2532_v51 = vpop.permute.xlu2 %2531 }
 0x342   : > { %2857 = vst.msk [vmem:[%s3775_s25 + $0xc8] sm:$0x1] %vm694_vm10, %v2532_v51 }
 0x343   : > { %v2522_v50 = vpop.permute.xlu0 %2521 }
 0x344   : > { %2852 = vst.msk [vmem:[%s3775_s25 + $0x50] sm:$0x1] %vm694_vm10, %v2522_v50 }
 0x347   : > { %v2518_v54 = vpop.permute.xlu1 %2517 }
 0x348   : > { %2850 = vst.msk [vmem:[%s3775_s25 + $0x20] sm:$0x1] %vm694_vm10, %v2518_v54 }
 0x349   : > { %v2538_v56 = vpop.permute.xlu2 %2537 }
 0x34a   : > { %2860 = vst.msk [vmem:[%s3775_s25 + $0x110] sm:$0x1] %vm694_vm10, %v2538_v56 }
 0x34b   : > { %v2528_v53 = vpop.permute.xlu0 %2527 }
 0x34c   : > { %2855 = vst.msk [vmem:[%s3775_s25 + $0x98] sm:$0x1] %vm694_vm10, %v2528_v53 }
 0x34f   : > { %v2524_v52 = vpop.permute.xlu1 %2523 }
 0x350   : > { %2853 = vst.msk [vmem:[%s3775_s25 + $0x68] sm:$0x1] %vm694_vm10, %v2524_v52 }
 0x351   : > { %v2544_v59 = vpop.permute.xlu2 %2543 }
 0x352   : > { %2863 = vst.msk [vmem:[%s3775_s25 + $0x158] sm:$0x1] %vm694_vm10, %v2544_v59 }
 0x353   : > { %v2534_v57 = vpop.permute.xlu0 %2533 }
 0x354   : > { %2858 = vst.msk [vmem:[%s3775_s25 + $0xe0] sm:$0x1] %vm694_vm10, %v2534_v57 }
 0x357   : > { %v2530_v61 = vpop.permute.xlu1 %2529 }
 0x358   : > { %2856 = vst.msk [vmem:[%s3775_s25 + $0xb0] sm:$0x1] %vm694_vm10, %v2530_v61 }
 0x35b   : > { %v2540_v55 = vpop.permute.xlu0 %2539 }
 0x35c   : > { %2861 = vst.msk [vmem:[%s3775_s25 + $0x128] sm:$0x1] %vm694_vm10, %v2540_v55 }
 0x35f   : > { %v2536_v63 = vpop.permute.xlu1 %2535 }
 0x360   : > { %2859 = vst.msk [vmem:[%s3775_s25 + $0xf8] sm:$0x1] %vm694_vm10, %v2536_v63 }
 0x363   : > { %v2546_v62 = vpop.permute.xlu0 %2545 }
 0x364   : > { %2864 = vst.msk [vmem:[%s3775_s25 + $0x170] sm:$0x1] %vm694_vm10, %v2546_v62 }
 0x367   : > { %v2542_v1 = vpop.permute.xlu1 %2541 }
 0x368   : > { %2862 = vst.msk [vmem:[%s3775_s25 + $0x140] sm:$0x1] %vm694_vm10, %v2542_v1 }
 0x369 PF: > { %s16_s19 = sadd.s32 1, %s3117_s19   ;;  %s4437_s12 = smov %s3093_s13 }
 0x36a   : > { %p13_p2 = scmp.ge.s32.totalorder %s16_s19, 6   ;;  %s4438_s13 = smov %s3097_s14 }
 0x36b   : > { %s4439_s14 = smov %s3212_s5  ;;  %s4440_s15 = smov %s3109_s17 }
 0x36c   : > { %s4441_s16 = smov %s3113_s18  ;;  %s4442_s17 = smov %s4445_s21 }
 0x36d   : > { %s4443_s18 = smov %s4449_s22  ;;  %15 = sbr.rel (!%p13_p2) target bundleno = 5 (0x5), region = 84 }
 0x372   :  { %2601 = vsyncpa [#allocation3], 1 }
 0x373   :  { %2603 = vsyncpa [#allocation3 + $0x1], 1 }

</bundles_post_ra>
